<compile_context>
chip_gen: v6e
topology: v6e:2x2x1
jax: 0.10.0
libtpu: 0.0.40
codegen_flags: <defaults>
</compile_context>

<pallas_src>
import jax
import jax.numpy as jnp
from jax.experimental import pallas as pl
from jax.experimental.pallas import tpu as pltpu

IN_DIM = 768
HIDDEN_DIMS = (512, 512, 256, 128, 64, 32)
NUM_LABELS = 3
LANE = 128
SUBLANE = 8
PAD_OUT = 128                       # classifier output padded to 128 lanes

LOGICAL_DIMS = (IN_DIM,) + HIDDEN_DIMS + (NUM_LABELS,)
# Pad every activation width (not the 768 input) up to at least 128 lanes.
PADDED_DIMS = (LOGICAL_DIMS[0],) + tuple(max(LANE, d) for d in LOGICAL_DIMS[1:])
# -> (768, 512, 512, 256, 128, 128, 128, 128)
N_LAYERS = len(LOGICAL_DIMS) - 1
PADDED_IN = PADDED_DIMS[:-1]
PADDED_OUT = PADDED_DIMS[1:]
BIAS_PACK_COLS = max(PADDED_OUT)    # 512


# ---- fused MLP kernel --------------------------------------------------------
def mlp_kernel(x_ref, w1, w2, w3, w4, w5, w6, w7, b_ref, o_ref):
    """x_ref: (TM,768) bf16; w_i: (pad_in,pad_out) bf16 (resident); b_ref:
    (8,512) f32 packed biases; o_ref: (TM,128) f32 lane-dense logits."""
    wrefs = (w1, w2, w3, w4, w5, w6, w7)
    b_all = b_ref[...]                                   # (8, 512) f32
    h = x_ref[...]                                       # (TM, 768) bf16
    for i, wr in enumerate(wrefs):                       # unrolled at trace time
        out_dim = PADDED_OUT[i]
        acc = jnp.dot(h, wr[...], preferred_element_type=jnp.float32)
        acc = acc + b_all[i:i + 1, :out_dim]             # bias add in f32
        if i < N_LAYERS - 1:
            h = jnp.maximum(acc, 0.0).astype(jnp.bfloat16)   # ReLU, back to bf16
        else:
            o_ref[...] = acc                             # (TM, 128) f32
        # Dropout(p=0.3) is identity at inference.


# ---- wrapper -----------------------------------------------------------------
def sentiment_mlp_forward(cls_embedding, params, *, tm=256):
    """cls_embedding: [B, 768] float32 -> logits [B, NUM_LABELS] float32."""
    ws, b_pack = params
    B = cls_embedding.shape[0]
    # Batch tile: TM rows per grid step (multiple of 8); tiny batches round up
    # to sublane granularity instead of spawning a degenerate tile.
    TM = tm if B >= tm else max(SUBLANE, pl.cdiv(B, SUBLANE) * SUBLANE)
    B_pad = pl.cdiv(B, TM) * TM

    x = cls_embedding.astype(jnp.bfloat16)
    if B_pad != B:
        x = jnp.pad(x, ((0, B_pad - B), (0, 0)))

    flops = 2 * B_pad * sum(pi * po for pi, po in zip(PADDED_IN, PADDED_OUT))
    bytes_accessed = (B_pad * IN_DIM * 2                      # x (bf16)
                      + sum(int(w.size) * 2 for w in ws)      # weights (bf16)
                      + int(b_pack.size) * 4                  # biases (f32)
                      + B_pad * PAD_OUT * 4)                  # output (f32)

    w_specs = [pl.BlockSpec(tuple(w.shape), lambda i: (0, 0)) for w in ws]

    out = pl.pallas_call(
        mlp_kernel,
        out_shape=jax.ShapeDtypeStruct((B_pad, PAD_OUT), jnp.float32),
        grid=(B_pad // TM,),
        in_specs=[pl.BlockSpec((TM, IN_DIM), lambda i: (i, 0))]   # streamed x
                 + w_specs                                        # resident weights
                 + [pl.BlockSpec(tuple(b_pack.shape), lambda i: (0, 0))],
        out_specs=pl.BlockSpec((TM, PAD_OUT), lambda i: (i, 0)),
        compiler_params=pltpu.CompilerParams(
            dimension_semantics=("parallel",)),                  # v7x megacore
        cost_estimate=pl.CostEstimate(
            flops=flops, transcendentals=0, bytes_accessed=bytes_accessed),
    )(x, *ws, b_pack)
    return out[:B, :NUM_LABELS]


# ---- parameters --------------------------------------------------------------
def init_params(key):
    """Weights stored [in, out] (so y = x @ W + b), zero-padded to the lane-
    dense PADDED_* dims, bf16. Biases packed into one (8, 512) f32 array."""
    keys = jax.random.split(key, 2 * N_LAYERS)
    ws = []
    b_pack = jnp.zeros((SUBLANE, BIAS_PACK_COLS), jnp.float32)
    for i in range(N_LAYERS):
        fi, fo = LOGICAL_DIMS[i], LOGICAL_DIMS[i + 1]
        pi, po = PADDED_IN[i], PADDED_OUT[i]
        w = 0.02 * jax.random.normal(keys[2 * i], (fi, fo), dtype=jnp.float32)
        b = 0.01 * jax.random.normal(keys[2 * i + 1], (fo,), dtype=jnp.float32)
        w = jnp.pad(w, ((0, pi - fi), (0, po - fo)))   # zero pad -> exact zeros flow
        ws.append(w.astype(jnp.bfloat16))
        b_pack = b_pack.at[i, :fo].set(b)
    return tuple(ws), b_pack


def reference_forward(cls_embedding, params):
    """Pure-JAX reference using the same bf16 weights / f32 accumulation."""
    ws, b_pack = params
    h = cls_embedding.astype(jnp.bfloat16)
    out = None
    for i, w in enumerate(ws):
        out_dim = PADDED_OUT[i]
        acc = jnp.dot(h, w, preferred_element_type=jnp.float32)
        acc = acc + b_pack[i, :out_dim]
        if i < N_LAYERS - 1:
            h = jnp.maximum(acc, 0.0).astype(jnp.bfloat16)
        else:
            out = acc
    return out[:, :NUM_LABELS]


if __name__ == "__main__":
    B = 2
    root = jax.random.PRNGKey(0)
    pkey, xkey = jax.random.split(root)

    params = init_params(pkey)
    cls_embedding = jax.random.normal(xkey, (B, IN_DIM), dtype=jnp.float32)

    logits = jax.jit(sentiment_mlp_forward)(cls_embedding, params)
    jax.block_until_ready(logits)

    assert logits.shape == (B, NUM_LABELS) and logits.dtype == jnp.float32
    ref = reference_forward(cls_embedding, params)
    assert jnp.allclose(logits, ref, atol=1e-2, rtol=1e-2), \
        float(jnp.max(jnp.abs(logits - ref)))
    print("KERNEL_OK")
</pallas_src>

<mosaic_0001>
module attributes {stable_mosaic.version = 11 : i64} {
  func.func @mlp_kernel(%arg0: i32, %arg1: memref<8x768xbf16, #tpu.memory_space<vmem>>, %arg2: memref<768x512xbf16, #tpu.memory_space<vmem>>, %arg3: memref<512x512xbf16, #tpu.memory_space<vmem>>, %arg4: memref<512x256xbf16, #tpu.memory_space<vmem>>, %arg5: memref<256x128xbf16, #tpu.memory_space<vmem>>, %arg6: memref<128x128xbf16, #tpu.memory_space<vmem>>, %arg7: memref<128x128xbf16, #tpu.memory_space<vmem>>, %arg8: memref<128x128xbf16, #tpu.memory_space<vmem>>, %arg9: memref<8x512xf32, #tpu.memory_space<vmem>>, %arg10: memref<8x128xf32, #tpu.memory_space<vmem>>) attributes {dimension_semantics = [#tpu.dimension_semantics<parallel>], iteration_bounds = array<i64: 1>, scalar_prefetch = 0 : i64, scratch_operands = 0 : i64, tpu.core_type = #tpu.core_type<tc>, window_params = [{transform_indices = @transform_0, window_bounds = array<i64: 8, 768>}, {pipeline_mode = #tpu.pipeline_mode<synchronous>, transform_indices = @transform_1, window_bounds = array<i64: 768, 512>}, {pipeline_mode = #tpu.pipeline_mode<synchronous>, transform_indices = @transform_2, window_bounds = array<i64: 512, 512>}, {pipeline_mode = #tpu.pipeline_mode<synchronous>, transform_indices = @transform_3, window_bounds = array<i64: 512, 256>}, {pipeline_mode = #tpu.pipeline_mode<synchronous>, transform_indices = @transform_4, window_bounds = array<i64: 256, 128>}, {pipeline_mode = #tpu.pipeline_mode<synchronous>, transform_indices = @transform_5, window_bounds = array<i64: 128, 128>}, {pipeline_mode = #tpu.pipeline_mode<synchronous>, transform_indices = @transform_6, window_bounds = array<i64: 128, 128>}, {pipeline_mode = #tpu.pipeline_mode<synchronous>, transform_indices = @transform_7, window_bounds = array<i64: 128, 128>}, {pipeline_mode = #tpu.pipeline_mode<synchronous>, transform_indices = @transform_8, window_bounds = array<i64: 8, 512>}, {transform_indices = @transform_9, window_bounds = array<i64: 8, 128>}]} {
    %c0 = arith.constant 0 : index
    %c0_0 = arith.constant 0 : index
    %0 = vector.load %arg9[%c0, %c0_0] : memref<8x512xf32, #tpu.memory_space<vmem>>, vector<8x512xf32>
    %c0_1 = arith.constant 0 : index
    %c0_2 = arith.constant 0 : index
    %1 = vector.load %arg1[%c0_1, %c0_2] : memref<8x768xbf16, #tpu.memory_space<vmem>>, vector<8x768xbf16>
    %c0_3 = arith.constant 0 : index
    %c0_4 = arith.constant 0 : index
    %2 = vector.load %arg2[%c0_3, %c0_4] : memref<768x512xbf16, #tpu.memory_space<vmem>>, vector<768x512xbf16>
    %cst = arith.constant dense<0.000000e+00> : vector<8x512xf32>
    %3 = tpu.matmul %1, %2, %cst {dimension_numbers = #tpu.dot_dimension_numbers<[1], [0], [0], [1], [0, 0, 1, 1], [], []>} : vector<8x768xbf16>, vector<768x512xbf16>, vector<8x512xf32> -> vector<8x512xf32>
    %4 = vector.extract_strided_slice %0 {offsets = [0, 0], sizes = [1, 512], strides = [1, 1]} : vector<8x512xf32> to vector<1x512xf32>
    %5 = vector.broadcast %4 : vector<1x512xf32> to vector<8x512xf32>
    %6 = arith.addf %3, %5 : vector<8x512xf32>
    %cst_5 = arith.constant 0.000000e+00 : f32
    %7 = vector.broadcast %cst_5 : f32 to vector<8x512xf32>
    %8 = arith.maximumf %6, %7 : vector<8x512xf32>
    %9 = arith.truncf %8 : vector<8x512xf32> to vector<8x512xbf16>
    %c0_6 = arith.constant 0 : index
    %c0_7 = arith.constant 0 : index
    %10 = vector.load %arg3[%c0_6, %c0_7] : memref<512x512xbf16, #tpu.memory_space<vmem>>, vector<512x512xbf16>
    %cst_8 = arith.constant dense<0.000000e+00> : vector<8x512xf32>
    %11 = tpu.matmul %9, %10, %cst_8 {dimension_numbers = #tpu.dot_dimension_numbers<[1], [0], [0], [1], [0, 0, 1, 1], [], []>} : vector<8x512xbf16>, vector<512x512xbf16>, vector<8x512xf32> -> vector<8x512xf32>
    %12 = vector.extract_strided_slice %0 {offsets = [1, 0], sizes = [1, 512], strides = [1, 1]} : vector<8x512xf32> to vector<1x512xf32>
    %13 = vector.broadcast %12 : vector<1x512xf32> to vector<8x512xf32>
    %14 = arith.addf %11, %13 : vector<8x512xf32>
    %cst_9 = arith.constant 0.000000e+00 : f32
    %15 = vector.broadcast %cst_9 : f32 to vector<8x512xf32>
    %16 = arith.maximumf %14, %15 : vector<8x512xf32>
    %17 = arith.truncf %16 : vector<8x512xf32> to vector<8x512xbf16>
    %c0_10 = arith.constant 0 : index
    %c0_11 = arith.constant 0 : index
    %18 = vector.load %arg4[%c0_10, %c0_11] : memref<512x256xbf16, #tpu.memory_space<vmem>>, vector<512x256xbf16>
    %cst_12 = arith.constant dense<0.000000e+00> : vector<8x256xf32>
    %19 = tpu.matmul %17, %18, %cst_12 {dimension_numbers = #tpu.dot_dimension_numbers<[1], [0], [0], [1], [0, 0, 1, 1], [], []>} : vector<8x512xbf16>, vector<512x256xbf16>, vector<8x256xf32> -> vector<8x256xf32>
    %20 = vector.extract_strided_slice %0 {offsets = [2, 0], sizes = [1, 256], strides = [1, 1]} : vector<8x512xf32> to vector<1x256xf32>
    %21 = vector.broadcast %20 : vector<1x256xf32> to vector<8x256xf32>
    %22 = arith.addf %19, %21 : vector<8x256xf32>
    %cst_13 = arith.constant 0.000000e+00 : f32
    %23 = vector.broadcast %cst_13 : f32 to vector<8x256xf32>
    %24 = arith.maximumf %22, %23 : vector<8x256xf32>
    %25 = arith.truncf %24 : vector<8x256xf32> to vector<8x256xbf16>
    %c0_14 = arith.constant 0 : index
    %c0_15 = arith.constant 0 : index
    %26 = vector.load %arg5[%c0_14, %c0_15] : memref<256x128xbf16, #tpu.memory_space<vmem>>, vector<256x128xbf16>
    %cst_16 = arith.constant dense<0.000000e+00> : vector<8x128xf32>
    %27 = tpu.matmul %25, %26, %cst_16 {dimension_numbers = #tpu.dot_dimension_numbers<[1], [0], [0], [1], [0, 0, 1, 1], [], []>} : vector<8x256xbf16>, vector<256x128xbf16>, vector<8x128xf32> -> vector<8x128xf32>
    %28 = vector.extract_strided_slice %0 {offsets = [3, 0], sizes = [1, 128], strides = [1, 1]} : vector<8x512xf32> to vector<1x128xf32>
    %29 = vector.broadcast %28 : vector<1x128xf32> to vector<8x128xf32>
    %30 = arith.addf %27, %29 : vector<8x128xf32>
    %cst_17 = arith.constant 0.000000e+00 : f32
    %31 = vector.broadcast %cst_17 : f32 to vector<8x128xf32>
    %32 = arith.maximumf %30, %31 : vector<8x128xf32>
    %33 = arith.truncf %32 : vector<8x128xf32> to vector<8x128xbf16>
    %c0_18 = arith.constant 0 : index
    %c0_19 = arith.constant 0 : index
    %34 = vector.load %arg6[%c0_18, %c0_19] : memref<128x128xbf16, #tpu.memory_space<vmem>>, vector<128x128xbf16>
    %cst_20 = arith.constant dense<0.000000e+00> : vector<8x128xf32>
    %35 = tpu.matmul %33, %34, %cst_20 {dimension_numbers = #tpu.dot_dimension_numbers<[1], [0], [0], [1], [0, 0, 1, 1], [], []>} : vector<8x128xbf16>, vector<128x128xbf16>, vector<8x128xf32> -> vector<8x128xf32>
    %36 = vector.extract_strided_slice %0 {offsets = [4, 0], sizes = [1, 128], strides = [1, 1]} : vector<8x512xf32> to vector<1x128xf32>
    %37 = vector.broadcast %36 : vector<1x128xf32> to vector<8x128xf32>
    %38 = arith.addf %35, %37 : vector<8x128xf32>
    %cst_21 = arith.constant 0.000000e+00 : f32
    %39 = vector.broadcast %cst_21 : f32 to vector<8x128xf32>
    %40 = arith.maximumf %38, %39 : vector<8x128xf32>
    %41 = arith.truncf %40 : vector<8x128xf32> to vector<8x128xbf16>
    %c0_22 = arith.constant 0 : index
    %c0_23 = arith.constant 0 : index
    %42 = vector.load %arg7[%c0_22, %c0_23] : memref<128x128xbf16, #tpu.memory_space<vmem>>, vector<128x128xbf16>
    %cst_24 = arith.constant dense<0.000000e+00> : vector<8x128xf32>
    %43 = tpu.matmul %41, %42, %cst_24 {dimension_numbers = #tpu.dot_dimension_numbers<[1], [0], [0], [1], [0, 0, 1, 1], [], []>} : vector<8x128xbf16>, vector<128x128xbf16>, vector<8x128xf32> -> vector<8x128xf32>
    %44 = vector.extract_strided_slice %0 {offsets = [5, 0], sizes = [1, 128], strides = [1, 1]} : vector<8x512xf32> to vector<1x128xf32>
    %45 = vector.broadcast %44 : vector<1x128xf32> to vector<8x128xf32>
    %46 = arith.addf %43, %45 : vector<8x128xf32>
    %cst_25 = arith.constant 0.000000e+00 : f32
    %47 = vector.broadcast %cst_25 : f32 to vector<8x128xf32>
    %48 = arith.maximumf %46, %47 : vector<8x128xf32>
    %49 = arith.truncf %48 : vector<8x128xf32> to vector<8x128xbf16>
    %c0_26 = arith.constant 0 : index
    %c0_27 = arith.constant 0 : index
    %50 = vector.load %arg8[%c0_26, %c0_27] : memref<128x128xbf16, #tpu.memory_space<vmem>>, vector<128x128xbf16>
    %cst_28 = arith.constant dense<0.000000e+00> : vector<8x128xf32>
    %51 = tpu.matmul %49, %50, %cst_28 {dimension_numbers = #tpu.dot_dimension_numbers<[1], [0], [0], [1], [0, 0, 1, 1], [], []>} : vector<8x128xbf16>, vector<128x128xbf16>, vector<8x128xf32> -> vector<8x128xf32>
    %52 = vector.extract_strided_slice %0 {offsets = [6, 0], sizes = [1, 128], strides = [1, 1]} : vector<8x512xf32> to vector<1x128xf32>
    %53 = vector.broadcast %52 : vector<1x128xf32> to vector<8x128xf32>
    %54 = arith.addf %51, %53 : vector<8x128xf32>
    %c0_29 = arith.constant 0 : index
    %c0_30 = arith.constant 0 : index
    %55 = vector.load %arg10[%c0_29, %c0_30] : memref<8x128xf32, #tpu.memory_space<vmem>>, vector<8x128xf32>
    tpu.vector_store %arg10[%c0_29, %c0_30], %54 {strides = array<i32>} : memref<8x128xf32, #tpu.memory_space<vmem>>, vector<8x128xf32>,
    return
  }
  func.func @transform_0(%arg0: i32) -> (i32, i32) {
    %c0_i32 = arith.constant 0 : i32
    %c0_i32_0 = arith.constant 0 : i32
    return %arg0, %c0_i32 : i32, i32
  }
  func.func @transform_1(%arg0: i32) -> (i32, i32) {
    %c0_i32 = arith.constant 0 : i32
    %c0_i32_0 = arith.constant 0 : i32
    %c0_i32_1 = arith.constant 0 : i32
    return %c0_i32, %c0_i32_0 : i32, i32
  }
  func.func @transform_2(%arg0: i32) -> (i32, i32) {
    %c0_i32 = arith.constant 0 : i32
    %c0_i32_0 = arith.constant 0 : i32
    %c0_i32_1 = arith.constant 0 : i32
    return %c0_i32, %c0_i32_0 : i32, i32
  }
  func.func @transform_3(%arg0: i32) -> (i32, i32) {
    %c0_i32 = arith.constant 0 : i32
    %c0_i32_0 = arith.constant 0 : i32
    %c0_i32_1 = arith.constant 0 : i32
    return %c0_i32, %c0_i32_0 : i32, i32
  }
  func.func @transform_4(%arg0: i32) -> (i32, i32) {
    %c0_i32 = arith.constant 0 : i32
    %c0_i32_0 = arith.constant 0 : i32
    %c0_i32_1 = arith.constant 0 : i32
    return %c0_i32, %c0_i32_0 : i32, i32
  }
  func.func @transform_5(%arg0: i32) -> (i32, i32) {
    %c0_i32 = arith.constant 0 : i32
    %c0_i32_0 = arith.constant 0 : i32
    %c0_i32_1 = arith.constant 0 : i32
    return %c0_i32, %c0_i32_0 : i32, i32
  }
  func.func @transform_6(%arg0: i32) -> (i32, i32) {
    %c0_i32 = arith.constant 0 : i32
    %c0_i32_0 = arith.constant 0 : i32
    %c0_i32_1 = arith.constant 0 : i32
    return %c0_i32, %c0_i32_0 : i32, i32
  }
  func.func @transform_7(%arg0: i32) -> (i32, i32) {
    %c0_i32 = arith.constant 0 : i32
    %c0_i32_0 = arith.constant 0 : i32
    %c0_i32_1 = arith.constant 0 : i32
    return %c0_i32, %c0_i32_0 : i32, i32
  }
  func.func @transform_8(%arg0: i32) -> (i32, i32) {
    %c0_i32 = arith.constant 0 : i32
    %c0_i32_0 = arith.constant 0 : i32
    %c0_i32_1 = arith.constant 0 : i32
    return %c0_i32, %c0_i32_0 : i32, i32
  }
  func.func @transform_9(%arg0: i32) -> (i32, i32) {
    %c0_i32 = arith.constant 0 : i32
    %c0_i32_0 = arith.constant 0 : i32
    return %arg0, %c0_i32 : i32, i32
  }
}

</mosaic_0001>

<bundles_post_ra>
// kernel: sentiment_mlp_forward.1
= control target key start
LH: loop header
LB: loop body
LE: loop exit
PB: predicated region body
PF: predicated region fallthrough
CT: control target
= control target key end

     0   :  { %14 = vsyncpa [#allocation3], 0  ;;  %s5086_s0 = inlined_call_operand.vmem [shape: bf16[8,768], index: 0, kind: input, shape index: {}]   ;;  %s5087_s1 = inlined_call_operand.hbm [shape: bf16[768,512], index: 1, kind: input, shape index: {}]   ;;  %s5088_s2 = inlined_call_operand.hbm [shape: bf16[512,512], index: 2, kind: input, shape index: {}]   ;;  %s5089_s3 = inlined_call_operand.hbm [shape: bf16[512,256], index: 3, kind: input, shape index: {}]   ;;  %s5090_s4 = inlined_call_operand.hbm [shape: bf16[256,128], index: 4, kind: input, shape index: {}]   ;;  %s5091_s5 = inlined_call_operand.hbm [shape: bf16[128,128], index: 5, kind: input, shape index: {}]   ;;  %s5092_s6 = inlined_call_operand.hbm [shape: bf16[128,128], index: 6, kind: input, shape index: {}]   ;;  %s5093_s7 = inlined_call_operand.hbm [shape: bf16[128,128], index: 7, kind: input, shape index: {}]   ;;  %s5094_s8 = inlined_call_operand.vmem [shape: f32[8,512], index: 8, kind: input, shape index: {}]   ;;  %s5095_s9 = inlined_call_operand.vmem [shape: f32[8,128], index: 9, kind: output, shape index: {}]  }
   0x1   :  { %15 = vsyncpa [#allocation5], 0 }
   0x2   :  { %16 = vsyncpa [#allocation8], 0 }
   0x3   :  { %17 = vsyncpa [#allocation11], 0  ;;  %s4847_s30 = smov [#allocation4]   ;;  %s4848_s11 = smov [#allocation7]  }
   0x4   :  { %s37_s10 = sshll.u32 %s4847_s30, 4  ;;  %s61_s12 = sshll.u32 %s4848_s11, 4  ;;  %s38_s10 = int_to_ptr.vmem [resolvable:$true] %s37_s10  ;;  %s62_s12 = int_to_ptr.vmem [resolvable:$true] %s61_s12 }
   0x5   :  { %s4707_s13 = scalar_lea.vmem %s38_s10, 16384  ;;  %p4712_p1 = scmp.lt.s32.totalorder %s38_s10, %s38_s10 }
   0x6   :  { %p4708_p0 = scmp.ne.s32.totalorder %s38_s10, %s4707_s13  ;;  %p4713_p2 = scmp.lt.s32.totalorder %s4707_s13, %s4707_s13 }
   0x8   :  { %p4714_p3 = por %p4713_p2, %p4712_p1 }
   0xa   :  { %p4715_p4 = pnand %p4714_p3, %p4708_p0 }
   0xc   :  { %4718 = shalt.err (!%p4715_p4)
}
   0xd   :  { %s4849_s14 = smov 256   ;;  %s4850_s15 = smov 16  }
   0xe   :  { %43 = dma.hbm_to_vmem [thread:$0]  %s5088_s2, 16384, %s38_s10, [#allocation5], %s4849_s14, %s4849_s14, %s4850_s15  }
   0xf   :  { %s4727_s18 = scalar_lea.vmem %s62_s12, 2048  ;;  %p4732_p6 = scmp.lt.s32.totalorder %s62_s12, %s62_s12 }
  0x10   :  { %p4728_p5 = scmp.ne.s32.totalorder %s62_s12, %s4727_s18  ;;  %p4733_p7 = scmp.lt.s32.totalorder %s4727_s18, %s4727_s18 }
  0x12   :  { %p4734_p8 = por %p4733_p7, %p4732_p6 }
  0x14   :  { %p4735_p9 = pnand %p4734_p8, %p4728_p5 }
  0x16   :  { %4738 = shalt.err (!%p4735_p9)
}
  0x17   :  { %s4851_s19 = smov 64   ;;  %s4852_s20 = smov 4  }
  0x18   :  { %67 = dma.hbm_to_vmem [thread:$0]  %s5090_s4, 2048, %s62_s12, [#allocation8], %s4851_s19, %s4851_s19, %s4852_s20  }
  0x19   :  { %s4853_s23 = smov [#allocation10]   ;;  %s4854_s25 = smov [#allocation2]  }
  0x1a   :  { %s85_s24 = sshll.u32 %s4853_s23, 4  ;;  %s25_s2 = sshll.u32 %s4854_s25, 4  ;;  %s86_s24 = int_to_ptr.vmem [resolvable:$true] %s85_s24  ;;  %s26_s2 = int_to_ptr.vmem [resolvable:$true] %s25_s2 }
  0x1b   :  { %s4747_s26 = scalar_lea.vmem %s86_s24, 1024  ;;  %p4752_p11 = scmp.lt.s32.totalorder %s86_s24, %s86_s24 }
  0x1c   :  { %p4748_p10 = scmp.ne.s32.totalorder %s86_s24, %s4747_s26  ;;  %p4753_p12 = scmp.lt.s32.totalorder %s4747_s26, %s4747_s26 }
  0x1e   :  { %p4754_p13 = por %p4753_p12, %p4752_p11 }
  0x20   :  { %p4755_p0 = pnand %p4754_p13, %p4748_p10 }
  0x22   :  { %4758 = shalt.err (!%p4755_p0)
}
  0x23   :  { %91 = dma.hbm_to_vmem [thread:$0]  %s5092_s6, 1024, %s86_s24, [#allocation11], %s4851_s19, %s4851_s19, %s4852_s20  }
  0x24   :  { %s4767_s4 = scalar_lea.vmem %s26_s2, 24576  ;;  %p4772_p2 = scmp.lt.s32.totalorder %s26_s2, %s26_s2 }
  0x25   :  { %p4768_p1 = scmp.ne.s32.totalorder %s26_s2, %s4767_s4  ;;  %p4773_p3 = scmp.lt.s32.totalorder %s4767_s4, %s4767_s4 }
  0x27   :  { %p4774_p4 = por %p4773_p3, %p4772_p2 }
  0x29   :  { %p4775_p5 = pnand %p4774_p4, %p4768_p1 }
  0x2b   :  { %4778 = shalt.err (!%p4775_p5)
}
  0x2c   :  { %31 = dma.hbm_to_vmem [thread:$0]  %s5087_s1, 24576, %s26_s2, [#allocation3], %s4849_s14, %s4849_s14, %s4850_s15  }
  0x2d   :  { %s4855_s10 = smov [#allocation6]  }
  0x2e   :  { %s49_s11 = sshll.u32 %s4855_s10, 4  ;;  %s50_s11 = int_to_ptr.vmem [resolvable:$true] %s49_s11 }
  0x2f   :  { %s4787_s12 = scalar_lea.vmem %s50_s11, 8192  ;;  %p4792_p7 = scmp.lt.s32.totalorder %s50_s11, %s50_s11 }
  0x30   :  { %p4788_p6 = scmp.ne.s32.totalorder %s50_s11, %s4787_s12  ;;  %p4793_p8 = scmp.lt.s32.totalorder %s4787_s12, %s4787_s12 }
  0x32   :  { %p4794_p9 = por %p4793_p8, %p4792_p7 }
  0x34   :  { %p4795_p10 = pnand %p4794_p9, %p4788_p6 }
  0x36   :  { %4798 = shalt.err (!%p4795_p10)
}
  0x37   :  { %s4856_s6 = smov 128   ;;  %s4857_s13 = smov 8  }
  0x38   :  { %55 = dma.hbm_to_vmem [thread:$0]  %s5089_s3, 8192, %s50_s11, [#allocation5], %s4856_s6, %s4856_s6, %s4857_s13  }
  0x39   :  { %s4858_s18 = smov [#allocation9]   ;;  %s4859_s1 = smov [#allocation12]  }
  0x3a   :  { %s73_s21 = sshll.u32 %s4858_s18, 4  ;;  %s97_s14 = sshll.u32 %s4859_s1, 4  ;;  %s74_s21 = int_to_ptr.vmem [resolvable:$true] %s73_s21  ;;  %s98_s14 = int_to_ptr.vmem [resolvable:$true] %s97_s14 }
  0x3b   :  { %s4807_s15 = scalar_lea.vmem %s74_s21, 1024  ;;  %p4812_p12 = scmp.lt.s32.totalorder %s74_s21, %s74_s21 }
  0x3c   :  { %p4808_p11 = scmp.ne.s32.totalorder %s74_s21, %s4807_s15  ;;  %p4813_p13 = scmp.lt.s32.totalorder %s4807_s15, %s4807_s15 }
  0x3e   :  { %p4814_p0 = por %p4813_p13, %p4812_p12 }
  0x40   :  { %p4815_p1 = pnand %p4814_p0, %p4808_p11 }
  0x42   :  { %4818 = shalt.err (!%p4815_p1)
}
  0x43   :  { %79 = dma.hbm_to_vmem [thread:$0]  %s5091_s5, 1024, %s74_s21, [#allocation8], %s4851_s19, %s4851_s19, %s4852_s20  }
  0x44   :  { %s4827_s3 = scalar_lea.vmem %s98_s14, 1024  ;;  %p4832_p3 = scmp.lt.s32.totalorder %s98_s14, %s98_s14 }
  0x45   :  { %p4828_p2 = scmp.ne.s32.totalorder %s98_s14, %s4827_s3  ;;  %p4833_p4 = scmp.lt.s32.totalorder %s4827_s3, %s4827_s3 }
  0x47   :  { %p4834_p5 = por %p4833_p4, %p4832_p3 }
  0x49   :  { %p4835_p6 = pnand %p4834_p5, %p4828_p2 }
  0x4b   :  { %4838 = shalt.err (!%p4835_p6)
}
  0x4c   :  { %103 = dma.hbm_to_vmem [thread:$0]  %s5093_s7, 1024, %s98_s14, [#allocation11], %s4851_s19, %s4851_s19, %s4852_s20  }
  0x4d   :  { %4839 = dma.done.wait [#allocation3], 24576  }
  0x4e   :  { %4840 = vsyncadd [#allocation3], 4294942720 }
  0x4f   :  { %4841 = dma.done.wait [#allocation5], 24576  }
  0x50   :  { %4842 = vsyncadd [#allocation5], 4294942720 }
  0x51   :  { %4843 = dma.done.wait [#allocation8], 3072  }
  0x52   :  { %4844 = vsyncadd [#allocation8], 4294964224 }
  0x53   :  { %4845 = dma.done.wait [#allocation11], 2048  }
  0x54   :  { %4846 = vsyncadd [#allocation11], 4294965248  ;;  %v4077_v0 = vld [vmem:[#allocation2 + $0xe4] ss:$16 sps:$4 sm:$0xff]   ;;  %v4081_v2 = vld [vmem:[#allocation2 + $0xe0] ss:$16 sps:$4 sm:$0xff]  }
  0x55   :  { %v4079_v1 = vld [vmem:[#allocation2 + $0x2e4] ss:$16 sps:$4 sm:$0xff]   ;;  %1324 = vmatprep.subr.bf16.mxu0 %v4077_v0  ;;  %v4082_v3 = vld [vmem:[#allocation2 + $0x2e0] ss:$16 sps:$4 sm:$0xff]   ;;  %v133_v48 = vld [vmem:[%s5086_s0 + $0x8] sm:$0xff]  ;;  %vm4861_vm0 = vmmov 0  }
  0x56   :  { %1365 = vmatprep.subr.bf16.mxu1 %v4079_v1  ;;  %v4083_v4 = vld [vmem:[#allocation2 + $0xc4] ss:$16 sps:$4 sm:$0xff]   ;;  %1325 = vmatpush1.bf16.msra.mxu0 %v4081_v2  ;;  %v4087_v6 = vld [vmem:[#allocation2 + $0xc0] ss:$16 sps:$4 sm:$0xff]   ;;  %v4959_v51 = vcombine.high %v133_v48, %v133_v48 }
  0x57   :  { %1366 = vmatpush1.bf16.msra.mxu1 %v4082_v3  ;;  %v4085_v5 = vld [vmem:[#allocation2 + $0x2c4] ss:$16 sps:$4 sm:$0xff]   ;;  %1326 = vmatprep.subr.bf16.mxu0 %v4083_v4  ;;  %v4088_v7 = vld [vmem:[#allocation2 + $0x2c0] ss:$16 sps:$4 sm:$0xff]  }
  0x58   :  { %1367 = vmatprep.subr.bf16.mxu1 %v4085_v5  ;;  %v4089_v8 = vld [vmem:[#allocation2 + $0xa4] ss:$16 sps:$4 sm:$0xff]   ;;  %v4093_v10 = vld [vmem:[#allocation2 + $0xa0] ss:$16 sps:$4 sm:$0xff]   ;;  %1397 = vmatprep.mubr.bf16.mxu1 %v4959_v51  ;;  %v4182_v5 = vld [vmem:[#allocation2 + $0xec] ss:$16 sps:$4 sm:$0xff]  }
  0x59   :  { %v4091_v9 = vld [vmem:[#allocation2 + $0x2a4] ss:$16 sps:$4 sm:$0xff]   ;;  %v4094_v11 = vld [vmem:[#allocation2 + $0x2a0] ss:$16 sps:$4 sm:$0xff]  }
  0x5a   :  { %1327 = vmatpush1.bf16.msra.mxu0 %v4087_v6  ;;  %v4095_v12 = vld [vmem:[#allocation2 + $0x84] ss:$16 sps:$4 sm:$0xff]   ;;  %v4099_v14 = vld [vmem:[#allocation2 + $0x80] ss:$16 sps:$4 sm:$0xff]  }
  0x5b   :  { %1368 = vmatpush1.bf16.msra.mxu1 %v4088_v7  ;;  %1328 = vmatprep.subr.bf16.mxu0 %v4089_v8  ;;  %v4097_v13 = vld [vmem:[#allocation2 + $0x284] ss:$16 sps:$4 sm:$0xff]   ;;  %v4100_v15 = vld [vmem:[#allocation2 + $0x280] ss:$16 sps:$4 sm:$0xff]   ;;  %v4965_v7 = vcombine.low %v133_v48, %v133_v48 }
  0x5c   :  { %1369 = vmatprep.subr.bf16.mxu1 %v4091_v9  ;;  %v4101_v16 = vld [vmem:[#allocation2 + $0x64] ss:$16 sps:$4 sm:$0xff]   ;;  %v4105_v18 = vld [vmem:[#allocation2 + $0x60] ss:$16 sps:$4 sm:$0xff]   ;;  %v4180_v9 = vld [vmem:[#allocation2 + $0xe8] ss:$16 sps:$4 sm:$0xff]  }
  0x5d   :  { %v4103_v17 = vld [vmem:[#allocation2 + $0x264] ss:$16 sps:$4 sm:$0xff]   ;;  %v4106_v19 = vld [vmem:[#allocation2 + $0x260] ss:$16 sps:$4 sm:$0xff]  }
  0x5e   :  { %1329 = vmatpush1.bf16.msra.mxu0 %v4093_v10  ;;  %v4107_v20 = vld [vmem:[#allocation2 + $0x44] ss:$16 sps:$4 sm:$0xff]   ;;  %v4111_v22 = vld [vmem:[#allocation2 + $0x40] ss:$16 sps:$4 sm:$0xff]  }
  0x5f   :  { %1370 = vmatpush1.bf16.msra.mxu1 %v4094_v11  ;;  %1330 = vmatprep.subr.bf16.mxu0 %v4095_v12  ;;  %v4109_v21 = vld [vmem:[#allocation2 + $0x244] ss:$16 sps:$4 sm:$0xff]   ;;  %v4112_v23 = vld [vmem:[#allocation2 + $0x240] ss:$16 sps:$4 sm:$0xff]   ;;  %v4188_v11 = vld [vmem:[#allocation2 + $0xcc] ss:$16 sps:$4 sm:$0xff]  }
  0x60   :  { %1371 = vmatprep.subr.bf16.mxu1 %v4097_v13  ;;  %v4113_v24 = vld [vmem:[#allocation2 + $0x24] ss:$16 sps:$4 sm:$0xff]   ;;  %v4117_v26 = vld [vmem:[#allocation2 + $0x20] ss:$16 sps:$4 sm:$0xff]   ;;  %v4186_v13 = vld [vmem:[#allocation2 + $0xc8] ss:$16 sps:$4 sm:$0xff]  }
  0x61   :  { %v4115_v25 = vld [vmem:[#allocation2 + $0x224] ss:$16 sps:$4 sm:$0xff]   ;;  %v4118_v27 = vld [vmem:[#allocation2 + $0x220] ss:$16 sps:$4 sm:$0xff]  }
  0x62   :  { %1331 = vmatpush1.bf16.msra.mxu0 %v4099_v14  ;;  %v4119_v28 = vld [vmem:[#allocation2 + $0x4] ss:$16 sps:$4 sm:$0xff]   ;;  %v4123_v30 = vld [vmem:[#allocation2] ss:$16 sps:$4 sm:$0xff]  }
  0x63   :  { %1372 = vmatpush1.bf16.msra.mxu1 %v4100_v15  ;;  %1332 = vmatprep.subr.bf16.mxu0 %v4101_v16  ;;  %v4121_v29 = vld [vmem:[#allocation2 + $0x204] ss:$16 sps:$4 sm:$0xff]   ;;  %v4124_v31 = vld [vmem:[#allocation2 + $0x200] ss:$16 sps:$4 sm:$0xff]   ;;  %v4194_v15 = vld [vmem:[#allocation2 + $0xac] ss:$16 sps:$4 sm:$0xff]  }
  0x64   :  { %1373 = vmatprep.subr.bf16.mxu1 %v4103_v17  ;;  %v4125_v32 = vld [vmem:[#allocation2 + $0x1e4] ss:$16 sps:$4 sm:$0xff]   ;;  %v4129_v34 = vld [vmem:[#allocation2 + $0x1e0] ss:$16 sps:$4 sm:$0xff]   ;;  %v4192_v17 = vld [vmem:[#allocation2 + $0xa8] ss:$16 sps:$4 sm:$0xff]  }
  0x65   :  { %v4127_v33 = vld [vmem:[#allocation2 + $0x3e4] ss:$16 sps:$4 sm:$0xff]   ;;  %v4130_v35 = vld [vmem:[#allocation2 + $0x3e0] ss:$16 sps:$4 sm:$0xff]  }
  0x66   :  { %1333 = vmatpush1.bf16.msra.mxu0 %v4105_v18  ;;  %v4131_v36 = vld [vmem:[#allocation2 + $0x1c4] ss:$16 sps:$4 sm:$0xff]   ;;  %v4135_v38 = vld [vmem:[#allocation2 + $0x1c0] ss:$16 sps:$4 sm:$0xff]  }
  0x67   :  { %1374 = vmatpush1.bf16.msra.mxu1 %v4106_v19  ;;  %1334 = vmatprep.subr.bf16.mxu0 %v4107_v20  ;;  %v4133_v37 = vld [vmem:[#allocation2 + $0x3c4] ss:$16 sps:$4 sm:$0xff]   ;;  %v4136_v39 = vld [vmem:[#allocation2 + $0x3c0] ss:$16 sps:$4 sm:$0xff]   ;;  %v4200_v19 = vld [vmem:[#allocation2 + $0x8c] ss:$16 sps:$4 sm:$0xff]  }
  0x68   :  { %1375 = vmatprep.subr.bf16.mxu1 %v4109_v21  ;;  %v4137_v40 = vld [vmem:[#allocation2 + $0x1a4] ss:$16 sps:$4 sm:$0xff]   ;;  %v4141_v42 = vld [vmem:[#allocation2 + $0x1a0] ss:$16 sps:$4 sm:$0xff]   ;;  %v4198_v21 = vld [vmem:[#allocation2 + $0x88] ss:$16 sps:$4 sm:$0xff]  }
  0x69   :  { %v4139_v41 = vld [vmem:[#allocation2 + $0x3a4] ss:$16 sps:$4 sm:$0xff]   ;;  %v4142_v43 = vld [vmem:[#allocation2 + $0x3a0] ss:$16 sps:$4 sm:$0xff]  }
  0x6a   :  { %1335 = vmatpush1.bf16.msra.mxu0 %v4111_v22  ;;  %v4143_v44 = vld [vmem:[#allocation2 + $0x184] ss:$16 sps:$4 sm:$0xff]   ;;  %v4147_v49 = vld [vmem:[#allocation2 + $0x180] ss:$16 sps:$4 sm:$0xff]  }
  0x6b   :  { %1376 = vmatpush1.bf16.msra.mxu1 %v4112_v23  ;;  %1336 = vmatprep.subr.bf16.mxu0 %v4113_v24  ;;  %v4145_v45 = vld [vmem:[#allocation2 + $0x384] ss:$16 sps:$4 sm:$0xff]   ;;  %v4148_v50 = vld [vmem:[#allocation2 + $0x380] ss:$16 sps:$4 sm:$0xff]   ;;  %v4206_v23 = vld [vmem:[#allocation2 + $0x6c] ss:$16 sps:$4 sm:$0xff]  }
  0x6c   :  { %1377 = vmatprep.subr.bf16.mxu1 %v4115_v25  ;;  %v132_v46 = vld [vmem:[%s5086_s0] sm:$0xff]  ;;  %v4204_v25 = vld [vmem:[#allocation2 + $0x68] ss:$16 sps:$4 sm:$0xff]  }
  0x6d   :  { %v4954_v47 = vcombine.high %v132_v46, %v132_v46  ;;  %v4149_v52 = vld [vmem:[#allocation2 + $0x164] ss:$16 sps:$4 sm:$0xff]   ;;  %v4153_v54 = vld [vmem:[#allocation2 + $0x160] ss:$16 sps:$4 sm:$0xff]   ;;  %v4963_v6 = vcombine.low %v132_v46, %v132_v46 }
  0x6e   :  { %1337 = vmatpush1.bf16.msra.mxu0 %v4117_v26  ;;  %v4151_v53 = vld [vmem:[#allocation2 + $0x364] ss:$16 sps:$4 sm:$0xff]   ;;  %v4154_v55 = vld [vmem:[#allocation2 + $0x360] ss:$16 sps:$4 sm:$0xff]  }
  0x6f   :  { %1378 = vmatpush1.bf16.msra.mxu1 %v4118_v27  ;;  %1338 = vmatprep.subr.bf16.mxu0 %v4119_v28  ;;  %v4155_v56 = vld [vmem:[#allocation2 + $0x144] ss:$16 sps:$4 sm:$0xff]   ;;  %v4159_v58 = vld [vmem:[#allocation2 + $0x140] ss:$16 sps:$4 sm:$0xff]   ;;  %v4212_v27 = vld [vmem:[#allocation2 + $0x4c] ss:$16 sps:$4 sm:$0xff]  }
  0x70   :  { %1379 = vmatprep.subr.bf16.mxu1 %v4121_v29  ;;  %1356 = vmatprep.mubr.bf16.mxu0 %v4954_v47  ;;  %v4157_v57 = vld [vmem:[#allocation2 + $0x344] ss:$16 sps:$4 sm:$0xff]   ;;  %v4160_v59 = vld [vmem:[#allocation2 + $0x340] ss:$16 sps:$4 sm:$0xff]   ;;  %v4210_v29 = vld [vmem:[#allocation2 + $0x48] ss:$16 sps:$4 sm:$0xff]  }
  0x71   :  { %v4161_v60 = vld [vmem:[#allocation2 + $0x124] ss:$16 sps:$4 sm:$0xff]   ;;  %v4165_v62 = vld [vmem:[#allocation2 + $0x120] ss:$16 sps:$4 sm:$0xff]  }
  0x72   :  { %1339 = vmatpush1.bf16.msra.mxu0 %v4123_v30  ;;  %v4163_v61 = vld [vmem:[#allocation2 + $0x324] ss:$16 sps:$4 sm:$0xff]   ;;  %v4166_v63 = vld [vmem:[#allocation2 + $0x320] ss:$16 sps:$4 sm:$0xff]  }
  0x73   :  { %1380 = vmatpush1.bf16.msra.mxu1 %v4124_v31  ;;  %1340 = vmatprep.subr.bf16.mxu0 %v4125_v32  ;;  %v4167_v0 = vld [vmem:[#allocation2 + $0x104] ss:$16 sps:$4 sm:$0xff]   ;;  %v4171_v2 = vld [vmem:[#allocation2 + $0x100] ss:$16 sps:$4 sm:$0xff]   ;;  %v4218_v31 = vld [vmem:[#allocation2 + $0x2c] ss:$16 sps:$4 sm:$0xff]  }
  0x74   :  { %1381 = vmatprep.subr.bf16.mxu1 %v4127_v33  ;;  %v4169_v1 = vld [vmem:[#allocation2 + $0x304] ss:$16 sps:$4 sm:$0xff]   ;;  %v4172_v3 = vld [vmem:[#allocation2 + $0x300] ss:$16 sps:$4 sm:$0xff]  }
  0x75   :  { %v4179_v4 = vld [vmem:[#allocation2 + $0x4e4] ss:$16 sps:$4 sm:$0xff]   ;;  %v4177_v8 = vld [vmem:[#allocation2 + $0x4e0] ss:$16 sps:$4 sm:$0xff]  }
  0x76   :  { %1341 = vmatpush2.bf16.msra.mxu0 %v4129_v34  ;;  %v4185_v10 = vld [vmem:[#allocation2 + $0x4c4] ss:$16 sps:$4 sm:$0xff]   ;;  %v4183_v12 = vld [vmem:[#allocation2 + $0x4c0] ss:$16 sps:$4 sm:$0xff]  }
  0x77   :  { %1382 = vmatpush2.bf16.msra.mxu1 %v4130_v35  ;;  %1342 = vmatprep.subr.bf16.mxu0 %v4131_v36  ;;  %v4191_v14 = vld [vmem:[#allocation2 + $0x4a4] ss:$16 sps:$4 sm:$0xff]   ;;  %v4189_v16 = vld [vmem:[#allocation2 + $0x4a0] ss:$16 sps:$4 sm:$0xff]   ;;  %v4216_v35 = vld [vmem:[#allocation2 + $0x28] ss:$16 sps:$4 sm:$0xff]  }
  0x78   :  { %1383 = vmatprep.subr.bf16.mxu1 %v4133_v37  ;;  %v4197_v18 = vld [vmem:[#allocation2 + $0x484] ss:$16 sps:$4 sm:$0xff]   ;;  %v4195_v20 = vld [vmem:[#allocation2 + $0x480] ss:$16 sps:$4 sm:$0xff]   ;;  %v4224_v37 = vld [vmem:[#allocation2 + $0xc] ss:$16 sps:$4 sm:$0xff]  }
  0x79   :  { %v4203_v22 = vld [vmem:[#allocation2 + $0x464] ss:$16 sps:$4 sm:$0xff]   ;;  %v4201_v24 = vld [vmem:[#allocation2 + $0x460] ss:$16 sps:$4 sm:$0xff]  }
  0x7a   :  { %1343 = vmatpush2.bf16.msra.mxu0 %v4135_v38  ;;  %v4209_v26 = vld [vmem:[#allocation2 + $0x444] ss:$16 sps:$4 sm:$0xff]   ;;  %v4207_v28 = vld [vmem:[#allocation2 + $0x440] ss:$16 sps:$4 sm:$0xff]  }
  0x7b   :  { %1384 = vmatpush2.bf16.msra.mxu1 %v4136_v39  ;;  %1344 = vmatprep.subr.bf16.mxu0 %v4137_v40  ;;  %v4215_v30 = vld [vmem:[#allocation2 + $0x424] ss:$16 sps:$4 sm:$0xff]   ;;  %v4213_v33 = vld [vmem:[#allocation2 + $0x420] ss:$16 sps:$4 sm:$0xff]   ;;  %v4222_v39 = vld [vmem:[#allocation2 + $0x8] ss:$16 sps:$4 sm:$0xff]  }
  0x7c   :  { %1385 = vmatprep.subr.bf16.mxu1 %v4139_v41  ;;  %v4973_v32 = vld [vmem:[%s5086_s0 + $0x10] sm:$0xff]  ;;  %v4230_v41 = vld [vmem:[#allocation2 + $0x1ec] ss:$16 sps:$4 sm:$0xff]  }
  0x7d   :  { %v4977_v34 = vcombine.high %v4973_v32, %v4973_v32  ;;  %v4221_v36 = vld [vmem:[#allocation2 + $0x404] ss:$16 sps:$4 sm:$0xff]   ;;  %v4219_v38 = vld [vmem:[#allocation2 + $0x400] ss:$16 sps:$4 sm:$0xff]  }
  0x7e   :  { %1345 = vmatpush2.bf16.msra.mxu0 %v4141_v42  ;;  %v4227_v40 = vld [vmem:[#allocation2 + $0x5e4] ss:$16 sps:$4 sm:$0xff]   ;;  %v4225_v42 = vld [vmem:[#allocation2 + $0x5e0] ss:$16 sps:$4 sm:$0xff]  }
  0x7f   :  { %1386 = vmatpush2.bf16.msra.mxu1 %v4142_v43  ;;  %1346 = vmatprep.subr.bf16.mxu0 %v4143_v44  ;;  %v4228_v43 = vld [vmem:[#allocation2 + $0x1e8] ss:$16 sps:$4 sm:$0xff]   ;;  %v4233_v44 = vld [vmem:[#allocation2 + $0x5c4] ss:$16 sps:$4 sm:$0xff]   ;;  %v4231_v46 = vld [vmem:[#allocation2 + $0x5c0] ss:$16 sps:$4 sm:$0xff]  }
  0x80   :  { %1387 = vmatprep.subr.bf16.mxu1 %v4145_v45  ;;  %v4236_v45 = vld [vmem:[#allocation2 + $0x1cc] ss:$16 sps:$4 sm:$0xff]   ;;  %v4239_v48 = vld [vmem:[#allocation2 + $0x5a4] ss:$16 sps:$4 sm:$0xff]  }
  0x82   :  { %1347 = vmatpush2.bf16.msra.mxu0 %v4147_v49  ;;  %v4242_v49 = vld [vmem:[#allocation2 + $0x1ac] ss:$16 sps:$4 sm:$0xff]  }
  0x83   :  { %1388 = vmatpush2.bf16.msra.mxu1 %v4148_v50  ;;  %1348 = vmatprep.subr.bf16.mxu0 %v4149_v52  ;;  %v4237_v50 = vld [vmem:[#allocation2 + $0x5a0] ss:$16 sps:$4 sm:$0xff]   ;;  %v4240_v52 = vld [vmem:[#allocation2 + $0x1a8] ss:$16 sps:$4 sm:$0xff]  }
  0x84   :  { %1389 = vmatprep.subr.bf16.mxu1 %v4151_v53  ;;  %v4245_v53 = vld [vmem:[#allocation2 + $0x584] ss:$16 sps:$4 sm:$0xff]  }
  0x86   :  { %1349 = vmatpush2.bf16.msra.mxu0 %v4153_v54  ;;  %v4248_v54 = vld [vmem:[#allocation2 + $0x18c] ss:$16 sps:$4 sm:$0xff]  }
  0x87   :  { %1390 = vmatpush2.bf16.msra.mxu1 %v4154_v55  ;;  %1350 = vmatprep.subr.bf16.mxu0 %v4155_v56  ;;  %v4243_v55 = vld [vmem:[#allocation2 + $0x580] ss:$16 sps:$4 sm:$0xff]   ;;  %v4246_v56 = vld [vmem:[#allocation2 + $0x188] ss:$16 sps:$4 sm:$0xff]  }
  0x88   :  { %1391 = vmatprep.subr.bf16.mxu1 %v4157_v57  ;;  %v4251_v57 = vld [vmem:[#allocation2 + $0x564] ss:$16 sps:$4 sm:$0xff]  }
  0x8a   :  { %1351 = vmatpush2.bf16.msra.mxu0 %v4159_v58  ;;  %v4254_v58 = vld [vmem:[#allocation2 + $0x16c] ss:$16 sps:$4 sm:$0xff]  }
  0x8b   :  { %1392 = vmatpush2.bf16.msra.mxu1 %v4160_v59  ;;  %1352 = vmatprep.subr.bf16.mxu0 %v4161_v60  ;;  %v4249_v59 = vld [vmem:[#allocation2 + $0x560] ss:$16 sps:$4 sm:$0xff]   ;;  %v4252_v60 = vld [vmem:[#allocation2 + $0x168] ss:$16 sps:$4 sm:$0xff]  }
  0x8c   :  { %1393 = vmatprep.subr.bf16.mxu1 %v4163_v61  ;;  %v4257_v61 = vld [vmem:[#allocation2 + $0x544] ss:$16 sps:$4 sm:$0xff]  }
  0x8e   :  { %1353 = vmatpush2.bf16.msra.mxu0 %v4165_v62  ;;  %v4260_v62 = vld [vmem:[#allocation2 + $0x14c] ss:$16 sps:$4 sm:$0xff]  }
  0x8f   :  { %1394 = vmatpush2.bf16.msra.mxu1 %v4166_v63  ;;  %1354 = vmatprep.subr.bf16.mxu0 %v4167_v0  ;;  %v4255_v63 = vld [vmem:[#allocation2 + $0x540] ss:$16 sps:$4 sm:$0xff]   ;;  %v4258_v0 = vld [vmem:[#allocation2 + $0x148] ss:$16 sps:$4 sm:$0xff]  }
  0x90   :  { %1395 = vmatprep.subr.bf16.mxu1 %v4169_v1  ;;  %v4263_v1 = vld [vmem:[#allocation2 + $0x524] ss:$16 sps:$4 sm:$0xff]  }
  0x92   :  { %1355 = vmatpush2.bf16.msra.mxu0 %v4171_v2  ;;  %v4266_v2 = vld [vmem:[#allocation2 + $0x12c] ss:$16 sps:$4 sm:$0xff]  }
  0x93   :  { %1396 = vmatpush2.bf16.msra.mxu1 %v4172_v3  ;;  %1406 = vmatprep.subr.bf16.mxu0 %v4179_v4  ;;  %v4261_v3 = vld [vmem:[#allocation2 + $0x520] ss:$16 sps:$4 sm:$0xff]   ;;  %v4264_v4 = vld [vmem:[#allocation2 + $0x128] ss:$16 sps:$4 sm:$0xff]  }
  0x94   :  { %1447 = vmatprep.subr.bf16.mxu1 %v4182_v5  ;;  %v4269_v5 = vld [vmem:[#allocation2 + $0x504] ss:$16 sps:$4 sm:$0xff]  }
  0x95   :  { %1357 = vmatmul.mubr.bf16.vlgmr.msra.gmra.mxu0 %v4963_v6 }
  0x96   :  { %1398 = vmatmul.mubr.bf16.vlgmr.msra.gmra.mxu1 %v4965_v7  ;;  %1407 = vmatpush1.bf16.msra.mxu0 %v4177_v8  ;;  %v4272_v8 = vld [vmem:[#allocation2 + $0x10c] ss:$16 sps:$4 sm:$0xff]  }
  0x97   :  { %1448 = vmatpush1.bf16.msra.mxu1 %v4180_v9  ;;  %1408 = vmatprep.subr.bf16.mxu0 %v4185_v10  ;;  %v4267_v9 = vld [vmem:[#allocation2 + $0x500] ss:$16 sps:$4 sm:$0xff]   ;;  %v4270_v10 = vld [vmem:[#allocation2 + $0x108] ss:$16 sps:$4 sm:$0xff]  }
  0x98   :  { %1449 = vmatprep.subr.bf16.mxu1 %v4188_v11  ;;  %1479 = vmatprep.mubr.bf16.mxu1 %v4954_v47  ;;  %v4234_v47 = vld [vmem:[#allocation2 + $0x1c8] ss:$16 sps:$4 sm:$0xff]   ;;  %v4277_v11 = vld [vmem:[#allocation2 + $0x2ec] ss:$16 sps:$4 sm:$0xff]  }
  0x99   :  { %1438 = vmatprep.mubr.bf16.mxu0 %v4977_v34 }
  0x9a   :  { %1409 = vmatpush1.bf16.msra.mxu0 %v4183_v12  ;;  %v4280_v12 = vld [vmem:[#allocation2 + $0x4ec] ss:$16 sps:$4 sm:$0xff]  }
  0x9b   :  { %1450 = vmatpush1.bf16.msra.mxu1 %v4186_v13  ;;  %1410 = vmatprep.subr.bf16.mxu0 %v4191_v14  ;;  %v4982_v13 = vcombine.low %v4973_v32, %v4973_v32  ;;  %v4275_v14 = vld [vmem:[#allocation2 + $0x2e8] ss:$16 sps:$4 sm:$0xff]  }
  0x9c   :  { %1451 = vmatprep.subr.bf16.mxu1 %v4194_v15  ;;  %v4278_v15 = vld [vmem:[#allocation2 + $0x4e8] ss:$16 sps:$4 sm:$0xff]  }
  0x9d   :  { %v4305_v32 = vld [vmem:[#allocation2 + $0x248] ss:$16 sps:$4 sm:$0xff]  }
  0x9e   :  { %1411 = vmatpush1.bf16.msra.mxu0 %v4189_v16  ;;  %v4283_v16 = vld [vmem:[#allocation2 + $0x2cc] ss:$16 sps:$4 sm:$0xff]  }
  0x9f   :  { %1452 = vmatpush1.bf16.msra.mxu1 %v4192_v17  ;;  %1412 = vmatprep.subr.bf16.mxu0 %v4197_v18  ;;  %v4286_v17 = vld [vmem:[#allocation2 + $0x4cc] ss:$16 sps:$4 sm:$0xff]   ;;  %v4281_v18 = vld [vmem:[#allocation2 + $0x2c8] ss:$16 sps:$4 sm:$0xff]  }
  0xa0   :  { %1453 = vmatprep.subr.bf16.mxu1 %v4200_v19  ;;  %v4284_v19 = vld [vmem:[#allocation2 + $0x4c8] ss:$16 sps:$4 sm:$0xff]  }
  0xa2   :  { %1413 = vmatpush1.bf16.msra.mxu0 %v4195_v20  ;;  %v4289_v20 = vld [vmem:[#allocation2 + $0x2ac] ss:$16 sps:$4 sm:$0xff]  }
  0xa3   :  { %1454 = vmatpush1.bf16.msra.mxu1 %v4198_v21  ;;  %1414 = vmatprep.subr.bf16.mxu0 %v4203_v22  ;;  %v4292_v21 = vld [vmem:[#allocation2 + $0x4ac] ss:$16 sps:$4 sm:$0xff]   ;;  %v4287_v22 = vld [vmem:[#allocation2 + $0x2a8] ss:$16 sps:$4 sm:$0xff]  }
  0xa4   :  { %1455 = vmatprep.subr.bf16.mxu1 %v4206_v23  ;;  %v4290_v23 = vld [vmem:[#allocation2 + $0x4a8] ss:$16 sps:$4 sm:$0xff]  }
  0xa6   :  { %1415 = vmatpush1.bf16.msra.mxu0 %v4201_v24  ;;  %v4295_v24 = vld [vmem:[#allocation2 + $0x28c] ss:$16 sps:$4 sm:$0xff]  }
  0xa7   :  { %1456 = vmatpush1.bf16.msra.mxu1 %v4204_v25  ;;  %1416 = vmatprep.subr.bf16.mxu0 %v4209_v26  ;;  %v4298_v25 = vld [vmem:[#allocation2 + $0x48c] ss:$16 sps:$4 sm:$0xff]   ;;  %v4296_v26 = vld [vmem:[#allocation2 + $0x488] ss:$16 sps:$4 sm:$0xff]  }
  0xa8   :  { %1457 = vmatprep.subr.bf16.mxu1 %v4212_v27  ;;  %v4301_v27 = vld [vmem:[#allocation2 + $0x26c] ss:$16 sps:$4 sm:$0xff]  }
  0xaa   :  { %1417 = vmatpush1.bf16.msra.mxu0 %v4207_v28  ;;  %v4304_v28 = vld [vmem:[#allocation2 + $0x46c] ss:$16 sps:$4 sm:$0xff]  }
  0xab   :  { %1458 = vmatpush1.bf16.msra.mxu1 %v4210_v29  ;;  %1418 = vmatprep.subr.bf16.mxu0 %v4215_v30  ;;  %v4299_v29 = vld [vmem:[#allocation2 + $0x268] ss:$16 sps:$4 sm:$0xff]   ;;  %v4307_v30 = vld [vmem:[#allocation2 + $0x24c] ss:$16 sps:$4 sm:$0xff]  }
  0xac   :  { %1459 = vmatprep.subr.bf16.mxu1 %v4218_v31  ;;  %v4310_v31 = vld [vmem:[#allocation2 + $0x44c] ss:$16 sps:$4 sm:$0xff]  }
  0xae   :  { %1419 = vmatpush1.bf16.msra.mxu0 %v4213_v33  ;;  %v4308_v33 = vld [vmem:[#allocation2 + $0x448] ss:$16 sps:$4 sm:$0xff]  }
  0xaf   :  { %1460 = vmatpush1.bf16.msra.mxu1 %v4216_v35  ;;  %1420 = vmatprep.subr.bf16.mxu0 %v4221_v36  ;;  %v4316_v35 = vld [vmem:[#allocation2 + $0x42c] ss:$16 sps:$4 sm:$0xff]   ;;  %v4311_v36 = vld [vmem:[#allocation2 + $0x228] ss:$16 sps:$4 sm:$0xff]  }
  0xb0   :  { %1461 = vmatprep.subr.bf16.mxu1 %v4224_v37  ;;  %v4314_v37 = vld [vmem:[#allocation2 + $0x428] ss:$16 sps:$4 sm:$0xff]  }
  0xb2   :  { %1421 = vmatpush1.bf16.msra.mxu0 %v4219_v38  ;;  %v4319_v38 = vld [vmem:[#allocation2 + $0x20c] ss:$16 sps:$4 sm:$0xff]  }
  0xb3   :  { %1462 = vmatpush1.bf16.msra.mxu1 %v4222_v39  ;;  %1422 = vmatprep.subr.bf16.mxu0 %v4227_v40  ;;  %v4322_v39 = vld [vmem:[#allocation2 + $0x40c] ss:$16 sps:$4 sm:$0xff]   ;;  %v4317_v40 = vld [vmem:[#allocation2 + $0x208] ss:$16 sps:$4 sm:$0xff]  }
  0xb4   :  { %1463 = vmatprep.subr.bf16.mxu1 %v4230_v41  ;;  %v4320_v41 = vld [vmem:[#allocation2 + $0x408] ss:$16 sps:$4 sm:$0xff]  }
  0xb6   :  { %1423 = vmatpush2.bf16.msra.mxu0 %v4225_v42  ;;  %v4325_v42 = vld [vmem:[#allocation2 + $0x3ec] ss:$16 sps:$4 sm:$0xff]  }
  0xb7   :  { %1464 = vmatpush2.bf16.msra.mxu1 %v4228_v43  ;;  %1424 = vmatprep.subr.bf16.mxu0 %v4233_v44  ;;  %v4328_v43 = vld [vmem:[#allocation2 + $0x5ec] ss:$16 sps:$4 sm:$0xff]   ;;  %v4323_v44 = vld [vmem:[#allocation2 + $0x3e8] ss:$16 sps:$4 sm:$0xff]  }
  0xb8   :  { %1465 = vmatprep.subr.bf16.mxu1 %v4236_v45  ;;  %v4326_v45 = vld [vmem:[#allocation2 + $0x5e8] ss:$16 sps:$4 sm:$0xff]  }
  0xba   :  { %1425 = vmatpush2.bf16.msra.mxu0 %v4231_v46  ;;  %v4331_v46 = vld [vmem:[#allocation2 + $0x3cc] ss:$16 sps:$4 sm:$0xff]  }
  0xbb   :  { %1466 = vmatpush2.bf16.msra.mxu1 %v4234_v47  ;;  %1426 = vmatprep.subr.bf16.mxu0 %v4239_v48  ;;  %v4334_v47 = vld [vmem:[#allocation2 + $0x5cc] ss:$16 sps:$4 sm:$0xff]   ;;  %v4329_v48 = vld [vmem:[#allocation2 + $0x3c8] ss:$16 sps:$4 sm:$0xff]  }
  0xbc   :  { %1467 = vmatprep.subr.bf16.mxu1 %v4242_v49  ;;  %v4332_v49 = vld [vmem:[#allocation2 + $0x5c8] ss:$16 sps:$4 sm:$0xff]  }
  0xbe   :  { %1427 = vmatpush2.bf16.msra.mxu0 %v4237_v50  ;;  %v4337_v50 = vld [vmem:[#allocation2 + $0x3ac] ss:$16 sps:$4 sm:$0xff]  }
  0xbf   :  { %1468 = vmatpush2.bf16.msra.mxu1 %v4240_v52  ;;  %1428 = vmatprep.subr.bf16.mxu0 %v4245_v53  ;;  %v4340_v52 = vld [vmem:[#allocation2 + $0x5ac] ss:$16 sps:$4 sm:$0xff]   ;;  %v4335_v53 = vld [vmem:[#allocation2 + $0x3a8] ss:$16 sps:$4 sm:$0xff]  }
  0xc0   :  { %1469 = vmatprep.subr.bf16.mxu1 %v4248_v54  ;;  %v4338_v54 = vld [vmem:[#allocation2 + $0x5a8] ss:$16 sps:$4 sm:$0xff]  }
  0xc2   :  { %1429 = vmatpush2.bf16.msra.mxu0 %v4243_v55  ;;  %v4343_v55 = vld [vmem:[#allocation2 + $0x38c] ss:$16 sps:$4 sm:$0xff]  }
  0xc3   :  { %1470 = vmatpush2.bf16.msra.mxu1 %v4246_v56  ;;  %1430 = vmatprep.subr.bf16.mxu0 %v4251_v57  ;;  %v4346_v56 = vld [vmem:[#allocation2 + $0x58c] ss:$16 sps:$4 sm:$0xff]   ;;  %v4341_v57 = vld [vmem:[#allocation2 + $0x388] ss:$16 sps:$4 sm:$0xff]  }
  0xc4   :  { %1471 = vmatprep.subr.bf16.mxu1 %v4254_v58  ;;  %v4344_v58 = vld [vmem:[#allocation2 + $0x588] ss:$16 sps:$4 sm:$0xff]  }
  0xc6   :  { %1431 = vmatpush2.bf16.msra.mxu0 %v4249_v59  ;;  %v4349_v59 = vld [vmem:[#allocation2 + $0x36c] ss:$16 sps:$4 sm:$0xff]  }
  0xc7   :  { %1472 = vmatpush2.bf16.msra.mxu1 %v4252_v60  ;;  %1432 = vmatprep.subr.bf16.mxu0 %v4257_v61  ;;  %v4352_v60 = vld [vmem:[#allocation2 + $0x56c] ss:$16 sps:$4 sm:$0xff]   ;;  %v4347_v61 = vld [vmem:[#allocation2 + $0x368] ss:$16 sps:$4 sm:$0xff]  }
  0xc8   :  { %1473 = vmatprep.subr.bf16.mxu1 %v4260_v62  ;;  %v4350_v62 = vld [vmem:[#allocation2 + $0x568] ss:$16 sps:$4 sm:$0xff]  }
  0xca   :  { %1433 = vmatpush2.bf16.msra.mxu0 %v4255_v63  ;;  %v4355_v63 = vld [vmem:[#allocation2 + $0x34c] ss:$16 sps:$4 sm:$0xff]  }
  0xcb   :  { %1474 = vmatpush2.bf16.msra.mxu1 %v4258_v0  ;;  %1434 = vmatprep.subr.bf16.mxu0 %v4263_v1  ;;  %v4358_v0 = vld [vmem:[#allocation2 + $0x54c] ss:$16 sps:$4 sm:$0xff]   ;;  %v4353_v1 = vld [vmem:[#allocation2 + $0x348] ss:$16 sps:$4 sm:$0xff]  }
  0xcc   :  { %1475 = vmatprep.subr.bf16.mxu1 %v4266_v2  ;;  %v4356_v2 = vld [vmem:[#allocation2 + $0x548] ss:$16 sps:$4 sm:$0xff]  }
  0xce   :  { %1435 = vmatpush2.bf16.msra.mxu0 %v4261_v3  ;;  %v4361_v3 = vld [vmem:[#allocation2 + $0x32c] ss:$16 sps:$4 sm:$0xff]  }
  0xcf   :  { %1476 = vmatpush2.bf16.msra.mxu1 %v4264_v4  ;;  %1436 = vmatprep.subr.bf16.mxu0 %v4269_v5  ;;  %v4364_v4 = vld [vmem:[#allocation2 + $0x52c] ss:$16 sps:$4 sm:$0xff]   ;;  %v4359_v5 = vld [vmem:[#allocation2 + $0x328] ss:$16 sps:$4 sm:$0xff]  }
  0xd0   :  { %1477 = vmatprep.subr.bf16.mxu1 %v4272_v8  ;;  %v4362_v8 = vld [vmem:[#allocation2 + $0x528] ss:$16 sps:$4 sm:$0xff]  }
  0xd2   :  { %1437 = vmatpush2.bf16.msra.mxu0 %v4267_v9  ;;  %v4367_v9 = vld [vmem:[#allocation2 + $0x30c] ss:$16 sps:$4 sm:$0xff]  }
  0xd3   :  { %1478 = vmatpush2.bf16.msra.mxu1 %v4270_v10  ;;  %1488 = vmatprep.subr.bf16.mxu0 %v4277_v11  ;;  %v4370_v10 = vld [vmem:[#allocation2 + $0x50c] ss:$16 sps:$4 sm:$0xff]   ;;  %v4365_v11 = vld [vmem:[#allocation2 + $0x308] ss:$16 sps:$4 sm:$0xff]  }
  0xd4   :  { %1529 = vmatprep.subr.bf16.mxu1 %v4280_v12  ;;  %v4368_v12 = vld [vmem:[#allocation2 + $0x508] ss:$16 sps:$4 sm:$0xff]  }
  0xd5   :  { %1439 = vmatmul.mubr.bf16.vlgmr.msra.gmra.mxu0 %v4982_v13 }
  0xd6   :  { %1480 = vmatmul.mubr.bf16.vlgmr.msra.gmra.mxu1 %v4963_v6  ;;  %1489 = vmatpush1.bf16.msra.mxu0 %v4275_v14  ;;  %v4293_v6 = vld [vmem:[#allocation2 + $0x288] ss:$16 sps:$4 sm:$0xff]   ;;  %v4373_v14 = vld [vmem:[#allocation4 + $0xe4] ss:$16 sps:$4 sm:$0xff]  }
  0xd7   :  { %1530 = vmatpush1.bf16.msra.mxu1 %v4278_v15  ;;  %1490 = vmatprep.subr.bf16.mxu0 %v4283_v16  ;;  %v4371_v15 = vld [vmem:[#allocation4 + $0xe0] ss:$16 sps:$4 sm:$0xff]   ;;  %v4376_v16 = vld [vmem:[#allocation4 + $0xc4] ss:$16 sps:$4 sm:$0xff]  }
  0xd8   :  { %1531 = vmatprep.subr.bf16.mxu1 %v4286_v17  ;;  %1520 = vmatprep.mubr.bf16.mxu0 %v4959_v51  ;;  %v4302_v51 = vld [vmem:[#allocation2 + $0x468] ss:$16 sps:$4 sm:$0xff]   ;;  %v4374_v17 = vld [vmem:[#allocation4 + $0xc0] ss:$16 sps:$4 sm:$0xff]  }
  0xd9   :  { %1561 = vmatprep.mubr.bf16.mxu1 %v4977_v34  ;;  %v4313_v34 = vld [vmem:[#allocation2 + $0x22c] ss:$16 sps:$4 sm:$0xff]  }
  0xda   :  { %1491 = vmatpush1.bf16.msra.mxu0 %v4281_v18  ;;  %v4379_v18 = vld [vmem:[#allocation4 + $0xa4] ss:$16 sps:$4 sm:$0xff]  }
  0xdb   :  { %1532 = vmatpush1.bf16.msra.mxu1 %v4284_v19  ;;  %1492 = vmatprep.subr.bf16.mxu0 %v4289_v20  ;;  %v4377_v19 = vld [vmem:[#allocation4 + $0xa0] ss:$16 sps:$4 sm:$0xff]   ;;  %v4382_v20 = vld [vmem:[#allocation4 + $0x84] ss:$16 sps:$4 sm:$0xff]  }
  0xdc   :  { %1533 = vmatprep.subr.bf16.mxu1 %v4292_v21  ;;  %v4380_v21 = vld [vmem:[#allocation4 + $0x80] ss:$16 sps:$4 sm:$0xff]  }
  0xde   :  { %1493 = vmatpush1.bf16.msra.mxu0 %v4287_v22  ;;  %v4385_v22 = vld [vmem:[#allocation4 + $0x64] ss:$16 sps:$4 sm:$0xff]  }
  0xdf   :  { %1534 = vmatpush1.bf16.msra.mxu1 %v4290_v23  ;;  %1494 = vmatprep.subr.bf16.mxu0 %v4295_v24  ;;  %v4424_v23 = vld [vmem:[#allocation4 + $0x2e4] ss:$16 sps:$4 sm:$0xff]   ;;  %v4383_v24 = vld [vmem:[#allocation4 + $0x60] ss:$16 sps:$4 sm:$0xff]  }
  0xe0   :  { %1535 = vmatprep.subr.bf16.mxu1 %v4298_v25  ;;  %v4422_v25 = vld [vmem:[#allocation4 + $0x2e0] ss:$16 sps:$4 sm:$0xff]  }
  0xe2   :  { %1495 = vmatpush1.bf16.msra.mxu0 %v4293_v6  ;;  %v4388_v6 = vld [vmem:[#allocation4 + $0x44] ss:$16 sps:$4 sm:$0xff]  }
  0xe3   :  { %1536 = vmatpush1.bf16.msra.mxu1 %v4296_v26  ;;  %1496 = vmatprep.subr.bf16.mxu0 %v4301_v27  ;;  %v4428_v26 = vld [vmem:[#allocation4 + $0x2c0] ss:$16 sps:$4 sm:$0xff]   ;;  %v4391_v27 = vld [vmem:[#allocation4 + $0x24] ss:$16 sps:$4 sm:$0xff]  }
  0xe4   :  { %1537 = vmatprep.subr.bf16.mxu1 %v4304_v28  ;;  %v4436_v28 = vld [vmem:[#allocation4 + $0x2a4] ss:$16 sps:$4 sm:$0xff]  }
  0xe6   :  { %1497 = vmatpush1.bf16.msra.mxu0 %v4299_v29  ;;  %v4389_v29 = vld [vmem:[#allocation4 + $0x20] ss:$16 sps:$4 sm:$0xff]  }
  0xe7   :  { %1538 = vmatpush1.bf16.msra.mxu1 %v4302_v51  ;;  %1498 = vmatprep.subr.bf16.mxu0 %v4307_v30  ;;  %v4434_v51 = vld [vmem:[#allocation4 + $0x2a0] ss:$16 sps:$4 sm:$0xff]   ;;  %v4394_v30 = vld [vmem:[#allocation4 + $0x4] ss:$16 sps:$4 sm:$0xff]  }
  0xe8   :  { %1539 = vmatprep.subr.bf16.mxu1 %v4310_v31  ;;  %v4442_v31 = vld [vmem:[#allocation4 + $0x284] ss:$16 sps:$4 sm:$0xff]  }
  0xea   :  { %1499 = vmatpush1.bf16.msra.mxu0 %v4305_v32  ;;  %v4392_v32 = vld [vmem:[#allocation4] ss:$16 sps:$4 sm:$0xff]  }
  0xeb   :  { %1540 = vmatpush1.bf16.msra.mxu1 %v4308_v33  ;;  %1500 = vmatprep.subr.bf16.mxu0 %v4313_v34  ;;  %v4440_v33 = vld [vmem:[#allocation4 + $0x280] ss:$16 sps:$4 sm:$0xff]   ;;  %v4397_v34 = vld [vmem:[#allocation4 + $0x1e4] ss:$16 sps:$4 sm:$0xff]  }
  0xec   :  { %1541 = vmatprep.subr.bf16.mxu1 %v4316_v35  ;;  %v4448_v35 = vld [vmem:[#allocation4 + $0x264] ss:$16 sps:$4 sm:$0xff]  }
  0xee   :  { %1501 = vmatpush1.bf16.msra.mxu0 %v4311_v36  ;;  %v4395_v36 = vld [vmem:[#allocation4 + $0x1e0] ss:$16 sps:$4 sm:$0xff]  }
  0xef   :  { %1542 = vmatpush1.bf16.msra.mxu1 %v4314_v37  ;;  %1502 = vmatprep.subr.bf16.mxu0 %v4319_v38  ;;  %v4446_v37 = vld [vmem:[#allocation4 + $0x260] ss:$16 sps:$4 sm:$0xff]   ;;  %v4400_v38 = vld [vmem:[#allocation4 + $0x1c4] ss:$16 sps:$4 sm:$0xff]  }
  0xf0   :  { %1543 = vmatprep.subr.bf16.mxu1 %v4322_v39  ;;  %v4454_v39 = vld [vmem:[#allocation4 + $0x244] ss:$16 sps:$4 sm:$0xff]  }
  0xf2   :  { %1503 = vmatpush1.bf16.msra.mxu0 %v4317_v40  ;;  %v4398_v40 = vld [vmem:[#allocation4 + $0x1c0] ss:$16 sps:$4 sm:$0xff]  }
  0xf3   :  { %1544 = vmatpush1.bf16.msra.mxu1 %v4320_v41  ;;  %1504 = vmatprep.subr.bf16.mxu0 %v4325_v42  ;;  %v4452_v41 = vld [vmem:[#allocation4 + $0x240] ss:$16 sps:$4 sm:$0xff]   ;;  %v4403_v42 = vld [vmem:[#allocation4 + $0x1a4] ss:$16 sps:$4 sm:$0xff]  }
  0xf4   :  { %1545 = vmatprep.subr.bf16.mxu1 %v4328_v43  ;;  %v4460_v43 = vld [vmem:[#allocation4 + $0x224] ss:$16 sps:$4 sm:$0xff]  }
  0xf6   :  { %1505 = vmatpush2.bf16.msra.mxu0 %v4323_v44  ;;  %v4401_v44 = vld [vmem:[#allocation4 + $0x1a0] ss:$16 sps:$4 sm:$0xff]  }
  0xf7   :  { %1546 = vmatpush2.bf16.msra.mxu1 %v4326_v45  ;;  %1506 = vmatprep.subr.bf16.mxu0 %v4331_v46  ;;  %v4458_v45 = vld [vmem:[#allocation4 + $0x220] ss:$16 sps:$4 sm:$0xff]   ;;  %v4406_v46 = vld [vmem:[#allocation4 + $0x184] ss:$16 sps:$4 sm:$0xff]  }
  0xf8   :  { %1547 = vmatprep.subr.bf16.mxu1 %v4334_v47  ;;  %v4466_v47 = vld [vmem:[#allocation4 + $0x204] ss:$16 sps:$4 sm:$0xff]  }
  0xfa   :  { %1507 = vmatpush2.bf16.msra.mxu0 %v4329_v48  ;;  %v4404_v48 = vld [vmem:[#allocation4 + $0x180] ss:$16 sps:$4 sm:$0xff]  }
  0xfb   :  { %1548 = vmatpush2.bf16.msra.mxu1 %v4332_v49  ;;  %1508 = vmatprep.subr.bf16.mxu0 %v4337_v50  ;;  %v4464_v49 = vld [vmem:[#allocation4 + $0x200] ss:$16 sps:$4 sm:$0xff]   ;;  %v4409_v50 = vld [vmem:[#allocation4 + $0x164] ss:$16 sps:$4 sm:$0xff]  }
  0xfc   :  { %1549 = vmatprep.subr.bf16.mxu1 %v4340_v52  ;;  %v4472_v52 = vld [vmem:[#allocation4 + $0x3e4] ss:$16 sps:$4 sm:$0xff]  }
  0xfe   :  { %1509 = vmatpush2.bf16.msra.mxu0 %v4335_v53  ;;  %v4407_v53 = vld [vmem:[#allocation4 + $0x160] ss:$16 sps:$4 sm:$0xff]  }
  0xff   :  { %1550 = vmatpush2.bf16.msra.mxu1 %v4338_v54  ;;  %1510 = vmatprep.subr.bf16.mxu0 %v4343_v55  ;;  %v4470_v54 = vld [vmem:[#allocation4 + $0x3e0] ss:$16 sps:$4 sm:$0xff]   ;;  %v4412_v55 = vld [vmem:[#allocation4 + $0x144] ss:$16 sps:$4 sm:$0xff]  }
 0x100   :  { %1551 = vmatprep.subr.bf16.mxu1 %v4346_v56  ;;  %v4478_v56 = vld [vmem:[#allocation4 + $0x3c4] ss:$16 sps:$4 sm:$0xff]  }
 0x102   :  { %1511 = vmatpush2.bf16.msra.mxu0 %v4341_v57  ;;  %v4410_v57 = vld [vmem:[#allocation4 + $0x140] ss:$16 sps:$4 sm:$0xff]  }
 0x103   :  { %1552 = vmatpush2.bf16.msra.mxu1 %v4344_v58  ;;  %1512 = vmatprep.subr.bf16.mxu0 %v4349_v59  ;;  %v4476_v58 = vld [vmem:[#allocation4 + $0x3c0] ss:$16 sps:$4 sm:$0xff]   ;;  %v4415_v59 = vld [vmem:[#allocation4 + $0x124] ss:$16 sps:$4 sm:$0xff]  }
 0x104   :  { %1553 = vmatprep.subr.bf16.mxu1 %v4352_v60  ;;  %v4484_v60 = vld [vmem:[#allocation4 + $0x3a4] ss:$16 sps:$4 sm:$0xff]  }
 0x106   :  { %1513 = vmatpush2.bf16.msra.mxu0 %v4347_v61  ;;  %v4482_v61 = vld [vmem:[#allocation4 + $0x3a0] ss:$16 sps:$4 sm:$0xff]  }
 0x107   :  { %1554 = vmatpush2.bf16.msra.mxu1 %v4350_v62  ;;  %1514 = vmatprep.subr.bf16.mxu0 %v4355_v63  ;;  %v4413_v62 = vld [vmem:[#allocation4 + $0x120] ss:$16 sps:$4 sm:$0xff]   ;;  %v4418_v63 = vld [vmem:[#allocation4 + $0x104] ss:$16 sps:$4 sm:$0xff]  }
 0x108   :  { %1555 = vmatprep.subr.bf16.mxu1 %v4358_v0  ;;  %v4490_v0 = vld [vmem:[#allocation4 + $0x384] ss:$16 sps:$4 sm:$0xff]  }
 0x10a   :  { %1515 = vmatpush2.bf16.msra.mxu0 %v4353_v1  ;;  %v4488_v1 = vld [vmem:[#allocation4 + $0x380] ss:$16 sps:$4 sm:$0xff]  }
 0x10b   :  { %1556 = vmatpush2.bf16.msra.mxu1 %v4356_v2  ;;  %1516 = vmatprep.subr.bf16.mxu0 %v4361_v3  ;;  %v4416_v2 = vld [vmem:[#allocation4 + $0x100] ss:$16 sps:$4 sm:$0xff]   ;;  %v4421_v3 = vld [vmem:[#allocation4 + $0xec] ss:$16 sps:$4 sm:$0xff]  }
 0x10c   :  { %1557 = vmatprep.subr.bf16.mxu1 %v4364_v4  ;;  %v4496_v4 = vld [vmem:[#allocation4 + $0x364] ss:$16 sps:$4 sm:$0xff]  }
 0x10e   :  { %1517 = vmatpush2.bf16.msra.mxu0 %v4359_v5  ;;  %v4494_v5 = vld [vmem:[#allocation4 + $0x360] ss:$16 sps:$4 sm:$0xff]  }
 0x10f   :  { %1558 = vmatpush2.bf16.msra.mxu1 %v4362_v8  ;;  %1518 = vmatprep.subr.bf16.mxu0 %v4367_v9  ;;  %v4502_v8 = vld [vmem:[#allocation4 + $0x344] ss:$16 sps:$4 sm:$0xff]   ;;  %v4500_v9 = vld [vmem:[#allocation4 + $0x340] ss:$16 sps:$4 sm:$0xff]  }
 0x110   :  { %1559 = vmatprep.subr.bf16.mxu1 %v4370_v10 }
 0x112   :  { %1519 = vmatpush2.bf16.msra.mxu0 %v4365_v11 }
 0x113   :  { %1560 = vmatpush2.bf16.msra.mxu1 %v4368_v12  ;;  %2362 = vmatprep.subr.bf16.mxu0 %v4373_v14 }
 0x114   :  { %2403 = vmatprep.subr.bf16.mxu1 %v4424_v23  ;;  %v4517_v23 = vld [vmem:[#allocation4 + $0x2ec] ss:$16 sps:$4 sm:$0xff]  }
 0x115   :  { %1521 = vmatmul.mubr.bf16.vlgmr.msra.gmra.mxu0 %v4965_v7  ;;  %v4430_v7 = vld [vmem:[#allocation4 + $0x2c4] ss:$16 sps:$4 sm:$0xff]  }
 0x116   :  { %1562 = vmatmul.mubr.bf16.vlgmr.msra.gmra.mxu1 %v4982_v13  ;;  %2363 = vmatpush1.bf16.msra.mxu0 %v4371_v15  ;;  %v4386_v13 = vld [vmem:[#allocation4 + $0x40] ss:$16 sps:$4 sm:$0xff]   ;;  %v4508_v15 = vld [vmem:[#allocation4 + $0x324] ss:$16 sps:$4 sm:$0xff]  }
 0x117   :  { %2364 = vmatprep.subr.bf16.mxu0 %v4376_v16  ;;  %2404 = vmatpush1.bf16.msra.mxu1 %v4422_v25  ;;  %v4506_v16 = vld [vmem:[#allocation4 + $0x320] ss:$16 sps:$4 sm:$0xff]  }
 0x118   :  { %2405 = vmatprep.subr.bf16.mxu1 %v4430_v7  ;;  %v4998_v7 = vld [vmem:[%s5094_s8] sm:$0xff] }
 0x11a   :  { %2365 = vmatpush1.bf16.msra.mxu0 %v4374_v17 }
 0x11b   :  { %2366 = vmatprep.subr.bf16.mxu0 %v4379_v18  ;;  %2406 = vmatpush1.bf16.msra.mxu1 %v4428_v26 }
 0x11c   :  { %2407 = vmatprep.subr.bf16.mxu1 %v4436_v28 }
 0x11e   :  { %2367 = vmatpush1.bf16.msra.mxu0 %v4377_v19 }
 0x11f   :  { %2368 = vmatprep.subr.bf16.mxu0 %v4382_v20  ;;  %2408 = vmatpush1.bf16.msra.mxu1 %v4434_v51 }
 0x120   :  { %2409 = vmatprep.subr.bf16.mxu1 %v4442_v31 }
 0x122   :  { %2369 = vmatpush1.bf16.msra.mxu0 %v4380_v21  ;;  %v4514_v21 = vld [vmem:[#allocation4 + $0x304] ss:$16 sps:$4 sm:$0xff]  }
 0x123   :  { %2370 = vmatprep.subr.bf16.mxu0 %v4385_v22  ;;  %2410 = vmatpush1.bf16.msra.mxu1 %v4440_v33  ;;  %v4512_v22 = vld [vmem:[#allocation4 + $0x300] ss:$16 sps:$4 sm:$0xff]  }
 0x124   :  { %2411 = vmatprep.subr.bf16.mxu1 %v4448_v35 }
 0x126   :  { %2371 = vmatpush1.bf16.msra.mxu0 %v4383_v24  ;;  %v327_v24 = vlaneseq }
 0x127   :  { %2372 = vmatprep.subr.bf16.mxu0 %v4388_v6  ;;  %2412 = vmatpush1.bf16.msra.mxu1 %v4446_v37 }
 0x128   :  { %2413 = vmatprep.subr.bf16.mxu1 %v4454_v39  ;;  %v4990_v25 = vshrl.u32 %v327_v24, 7 }
 0x12a   :  { %2373 = vmatpush1.bf16.msra.mxu0 %v4386_v13  ;;  %v4993_v6 = vsub.s32 0, %v4990_v25  ;;  %v5003_v13 = vld [vmem:[%s5094_s8 + $0x8] sm:$0xff] }
 0x12b   :  { %2374 = vmatprep.subr.bf16.mxu0 %v4391_v27  ;;  %2414 = vmatpush1.bf16.msra.mxu1 %v4452_v41 }
 0x12c   :  { %2415 = vmatprep.subr.bf16.mxu1 %v4460_v43  ;;  %v330_v26 = vrot.slane %v4998_v7, %v4993_v6  ;;  %v334_v27 = vrot.slane %v5003_v13, %v4993_v6 }
 0x12e   :  { %2375 = vmatpush1.bf16.msra.mxu0 %v4389_v29 }
 0x12f   :  { %2376 = vmatprep.subr.bf16.mxu0 %v4394_v30  ;;  %2416 = vmatpush1.bf16.msra.mxu1 %v4458_v45 }
 0x130   :  { %2417 = vmatprep.subr.bf16.mxu1 %v4466_v47  ;;  %v4425_v47 = vld [vmem:[#allocation4 + $0xc8] ss:$16 sps:$4 sm:$0xff]  }
 0x132   :  { %2377 = vmatpush1.bf16.msra.mxu0 %v4392_v32 }
 0x133   :  { %2378 = vmatprep.subr.bf16.mxu0 %v4397_v34  ;;  %2418 = vmatpush1.bf16.msra.mxu1 %v4464_v49  ;;  %v4431_v49 = vld [vmem:[#allocation4 + $0xa8] ss:$16 sps:$4 sm:$0xff]  }
 0x134   :  { %2419 = vmatprep.subr.bf16.mxu1 %v4472_v52  ;;  %v4437_v52 = vld [vmem:[#allocation4 + $0x88] ss:$16 sps:$4 sm:$0xff]  }
 0x136   :  { %2379 = vmatpush2.bf16.msra.mxu0 %v4395_v36 }
 0x137   :  { %2380 = vmatprep.subr.bf16.mxu0 %v4400_v38  ;;  %2420 = vmatpush2.bf16.msra.mxu1 %v4470_v54  ;;  %v4443_v54 = vld [vmem:[#allocation4 + $0x68] ss:$16 sps:$4 sm:$0xff]  }
 0x138   :  { %2421 = vmatprep.subr.bf16.mxu1 %v4478_v56  ;;  %v4449_v56 = vld [vmem:[#allocation4 + $0x48] ss:$16 sps:$4 sm:$0xff]  }
 0x13a   :  { %2381 = vmatpush2.bf16.msra.mxu0 %v4398_v40 }
 0x13b   :  { %2382 = vmatprep.subr.bf16.mxu0 %v4403_v42  ;;  %2422 = vmatpush2.bf16.msra.mxu1 %v4476_v58  ;;  %v4455_v58 = vld [vmem:[#allocation4 + $0x28] ss:$16 sps:$4 sm:$0xff]  }
 0x13c   :  { %2423 = vmatprep.subr.bf16.mxu1 %v4484_v60  ;;  %v4461_v60 = vld [vmem:[#allocation4 + $0x8] ss:$16 sps:$4 sm:$0xff]  }
 0x13e   :  { %2383 = vmatpush2.bf16.msra.mxu0 %v4401_v44  ;;  %v4419_v44 = vld [vmem:[#allocation4 + $0xe8] ss:$16 sps:$4 sm:$0xff]  }
 0x13f   :  { %2384 = vmatprep.subr.bf16.mxu0 %v4406_v46  ;;  %2424 = vmatpush2.bf16.msra.mxu1 %v4482_v61  ;;  %v4427_v46 = vld [vmem:[#allocation4 + $0xcc] ss:$16 sps:$4 sm:$0xff]  }
 0x140   :  { %2425 = vmatprep.subr.bf16.mxu1 %v4490_v0  ;;  %v4469_v61 = vld [vmem:[#allocation4 + $0x1ec] ss:$16 sps:$4 sm:$0xff]   ;;  %v4473_v0 = vld [vmem:[#allocation4 + $0x1c8] ss:$16 sps:$4 sm:$0xff]  }
 0x142   :  { %2385 = vmatpush2.bf16.msra.mxu0 %v4404_v48  ;;  %v4433_v48 = vld [vmem:[#allocation4 + $0xac] ss:$16 sps:$4 sm:$0xff]  }
 0x143   :  { %2386 = vmatprep.subr.bf16.mxu0 %v4409_v50  ;;  %2426 = vmatpush2.bf16.msra.mxu1 %v4488_v1  ;;  %v4439_v50 = vld [vmem:[#allocation4 + $0x8c] ss:$16 sps:$4 sm:$0xff]  }
 0x144   :  { %2427 = vmatprep.subr.bf16.mxu1 %v4496_v4  ;;  %v4481_v1 = vld [vmem:[#allocation4 + $0x1ac] ss:$16 sps:$4 sm:$0xff]   ;;  %v4485_v4 = vld [vmem:[#allocation4 + $0x188] ss:$16 sps:$4 sm:$0xff]  }
 0x146   :  { %2387 = vmatpush2.bf16.msra.mxu0 %v4407_v53  ;;  %v4445_v53 = vld [vmem:[#allocation4 + $0x6c] ss:$16 sps:$4 sm:$0xff]  }
 0x147   :  { %2388 = vmatprep.subr.bf16.mxu0 %v4412_v55  ;;  %2428 = vmatpush2.bf16.msra.mxu1 %v4494_v5  ;;  %v4451_v55 = vld [vmem:[#allocation4 + $0x4c] ss:$16 sps:$4 sm:$0xff]  }
 0x148   :  { %2429 = vmatprep.subr.bf16.mxu1 %v4502_v8  ;;  %v4493_v5 = vld [vmem:[#allocation4 + $0x16c] ss:$16 sps:$4 sm:$0xff]   ;;  %v4491_v8 = vld [vmem:[#allocation4 + $0x168] ss:$16 sps:$4 sm:$0xff]  }
 0x14a   :  { %2389 = vmatpush2.bf16.msra.mxu0 %v4410_v57  ;;  %v4457_v57 = vld [vmem:[#allocation4 + $0x2c] ss:$16 sps:$4 sm:$0xff]  }
 0x14b   :  { %2390 = vmatprep.subr.bf16.mxu0 %v4415_v59  ;;  %2430 = vmatpush2.bf16.msra.mxu1 %v4500_v9  ;;  %v4463_v59 = vld [vmem:[#allocation4 + $0xc] ss:$16 sps:$4 sm:$0xff]   ;;  %v5019_v9 = vld [vmem:[%s5094_s8 + $0x10] sm:$0xff] }
 0x14c   :  { %2431 = vmatprep.subr.bf16.mxu1 %v4508_v15  ;;  %v4505_v15 = vld [vmem:[#allocation4 + $0x12c] ss:$16 sps:$4 sm:$0xff]  }
 0x14e   :  { %2391 = vmatpush2.bf16.msra.mxu0 %v4413_v62  ;;  %v4467_v62 = vld [vmem:[#allocation4 + $0x1e8] ss:$16 sps:$4 sm:$0xff]  }
 0x14f   :  { %2392 = vmatprep.subr.bf16.mxu0 %v4418_v63  ;;  %2432 = vmatpush2.bf16.msra.mxu1 %v4506_v16  ;;  %v4475_v63 = vld [vmem:[#allocation4 + $0x1cc] ss:$16 sps:$4 sm:$0xff]  }
 0x150   :  { %2433 = vmatprep.subr.bf16.mxu1 %v4514_v21  ;;  %v4511_v21 = vld [vmem:[#allocation4 + $0x10c] ss:$16 sps:$4 sm:$0xff]  }
 0x152   :  { %2393 = vmatpush2.bf16.msra.mxu0 %v4416_v2  ;;  %v4479_v2 = vld [vmem:[#allocation4 + $0x1a8] ss:$16 sps:$4 sm:$0xff]  }
 0x153   :  { %2444 = vmatprep.subr.bf16.mxu0 %v4421_v3  ;;  %2434 = vmatpush2.bf16.msra.mxu1 %v4512_v22  ;;  %v4487_v3 = vld [vmem:[#allocation4 + $0x18c] ss:$16 sps:$4 sm:$0xff]  }
 0x154   :  { %2485 = vmatprep.subr.bf16.mxu1 %v4517_v23 }
 0x155   :  { %v1358_v10 = vpop.f32.mrf.mxu0 }
 0x156   :  { %v1399_v11 = vpop.f32.mrf.mxu1  ;;  %v1359_v28 = vadd.f32 %v1358_v10, %v330_v26  ;;  %v4499_v10 = vld [vmem:[#allocation4 + $0x14c] ss:$16 sps:$4 sm:$0xff]  }
 0x157   :  { %v1360_v12 = vpop.f32.mrf.mxu0 }
 0x158   :  { %v1401_v14 = vpop.f32.mrf.mxu1  ;;  %v1361_v29 = vadd.f32 %v1360_v12, %v334_v27  ;;  %v1400_v51 = vadd.f32 %v1399_v11, %v1359_v28  ;;  %v5024_v11 = vld [vmem:[%s5094_s8 + $0x18] sm:$0xff]  ;;  %v338_v12 = vrot.slane %v5019_v9, %v4993_v6 }
 0x159   :  { %v1362_v17 = vpop.f32.mrf.mxu0  ;;  %v342_v16 = vrot.slane %v5024_v11, %v4993_v6 }
 0x15a   :  { %v1403_v18 = vpop.f32.mrf.mxu1  ;;  %v1402_v32 = vadd.f32 %v1401_v14, %v1361_v29  ;;  %v4497_v14 = vld [vmem:[#allocation4 + $0x148] ss:$16 sps:$4 sm:$0xff]  }
 0x15b   :  { %v1363_v19 = vpop.f32.mrf.mxu0  ;;  %v4503_v18 = vld [vmem:[#allocation4 + $0x128] ss:$16 sps:$4 sm:$0xff]  }
 0x15c   :  { %v1404_v20 = vpop.f32.mrf.mxu1  ;;  %v4509_v29 = vld [vmem:[#allocation4 + $0x108] ss:$16 sps:$4 sm:$0xff]  }
 0x195   :  { %v1440_v30 = vpop.f32.mrf.mxu0 }
 0x196   :  { %v5009_v31 = vpop.f32.mrf.mxu1  ;;  %v1441_v33 = vadd.f32 %v1440_v30, %v1400_v51 }
 0x197   :  { %v1442_v34 = vpop.f32.mrf.mxu0  ;;  %v1482_v17 = vadd.f32 %v5009_v31, %v338_v12  ;;  %v4589_v12 = vld [vmem:[#allocation6 + $0xf4] ss:$8 sps:$4 sm:$0xff]  }
 0x198   :  { %v5011_v35 = vpop.f32.mrf.mxu1  ;;  %v1443_v36 = vadd.f32 %v1442_v34, %v1402_v32  ;;  %v1570_v37 = vmax.f32 %v1441_v33, 0.0 }
 0x199   :  { %v1444_v38 = vpop.f32.mrf.mxu0  ;;  %v1484_v22 = vadd.f32 %v5011_v35, %v342_v16  ;;  %v4520_v35 = vld [vmem:[#allocation4 + $0x2cc] ss:$16 sps:$4 sm:$0xff]   ;;  %v4587_v16 = vld [vmem:[#allocation6 + $0xf0] ss:$8 sps:$4 sm:$0xff]  }
 0x19a   :  { %v1485_v39 = vpop.f32.mrf.mxu1  ;;  %v1571_v40 = vmax.f32 %v1443_v36, 0.0  ;;  %v5013_v45 = vpack.c.bf16 %v1570_v37, %v1570_v37  ;;  %v4515_v37 = vld [vmem:[#allocation4 + $0x2e8] ss:$16 sps:$4 sm:$0xff]  }
 0x19b   :  { %v1445_v41 = vpop.f32.mrf.mxu0  ;;  %v4518_v39 = vld [vmem:[#allocation4 + $0x2c8] ss:$16 sps:$4 sm:$0xff]  }
 0x19c   :  { %v1486_v42 = vpop.f32.mrf.mxu1  ;;  %v1575_v43 = vpack.c.bf16 %v1571_v40, %v1571_v40  ;;  %v4523_v40 = vld [vmem:[#allocation4 + $0x2ac] ss:$16 sps:$4 sm:$0xff]   ;;  %v4563_v41 = vld [vmem:[#allocation6 + $0x70] ss:$8 sps:$4 sm:$0xff]  }
 0x19d   :  { %v4565_v42 = vld [vmem:[#allocation6 + $0x74] ss:$8 sps:$4 sm:$0xff]  }
 0x19e   :  { %2394 = vmatprep.mubr.bf16.mxu0 %v1575_v43 }
 0x19f   :  { %2395 = vmatmul.mubr.bf16.vlgmr.msra.gmra.mxu0 %v5013_v45 }
 0x1a0   :  { %2445 = vmatpush1.bf16.msra.mxu0 %v4419_v44  ;;  %2476 = vmatprep.mubr.bf16.mxu0 %v1575_v43  ;;  %v4521_v43 = vld [vmem:[#allocation4 + $0x2a8] ss:$16 sps:$4 sm:$0xff]   ;;  %v4568_v44 = vld [vmem:[#allocation6 + $0x64] ss:$8 sps:$4 sm:$0xff]  }
 0x1a1   :  { %2446 = vmatprep.subr.bf16.mxu0 %v4427_v46  ;;  %v4526_v46 = vld [vmem:[#allocation4 + $0x28c] ss:$16 sps:$4 sm:$0xff]  }
 0x1a4   :  { %2447 = vmatpush1.bf16.msra.mxu0 %v4425_v47  ;;  %v4566_v47 = vld [vmem:[#allocation6 + $0x60] ss:$8 sps:$4 sm:$0xff]  }
 0x1a5   :  { %2448 = vmatprep.subr.bf16.mxu0 %v4433_v48  ;;  %v4524_v48 = vld [vmem:[#allocation4 + $0x288] ss:$16 sps:$4 sm:$0xff]  }
 0x1a8   :  { %2449 = vmatpush1.bf16.msra.mxu0 %v4431_v49  ;;  %v4529_v49 = vld [vmem:[#allocation4 + $0x26c] ss:$16 sps:$4 sm:$0xff]  }
 0x1a9   :  { %2450 = vmatprep.subr.bf16.mxu0 %v4439_v50  ;;  %v4569_v50 = vld [vmem:[#allocation6 + $0x50] ss:$8 sps:$4 sm:$0xff]  }
 0x1ac   :  { %2451 = vmatpush1.bf16.msra.mxu0 %v4437_v52  ;;  %v4574_v52 = vld [vmem:[#allocation6 + $0x44] ss:$8 sps:$4 sm:$0xff]  }
 0x1ad   :  { %2452 = vmatprep.subr.bf16.mxu0 %v4445_v53  ;;  %v4527_v53 = vld [vmem:[#allocation4 + $0x268] ss:$16 sps:$4 sm:$0xff]  }
 0x1b0   :  { %2453 = vmatpush1.bf16.msra.mxu0 %v4443_v54  ;;  %v4532_v54 = vld [vmem:[#allocation4 + $0x24c] ss:$16 sps:$4 sm:$0xff]  }
 0x1b1   :  { %2454 = vmatprep.subr.bf16.mxu0 %v4451_v55  ;;  %v4572_v55 = vld [vmem:[#allocation6 + $0x40] ss:$8 sps:$4 sm:$0xff]  }
 0x1b4   :  { %2455 = vmatpush1.bf16.msra.mxu0 %v4449_v56  ;;  %v4577_v56 = vld [vmem:[#allocation6 + $0x34] ss:$8 sps:$4 sm:$0xff]  }
 0x1b5   :  { %2456 = vmatprep.subr.bf16.mxu0 %v4457_v57  ;;  %v4530_v57 = vld [vmem:[#allocation4 + $0x248] ss:$16 sps:$4 sm:$0xff]  }
 0x1b8   :  { %2457 = vmatpush1.bf16.msra.mxu0 %v4455_v58  ;;  %v4535_v58 = vld [vmem:[#allocation4 + $0x22c] ss:$16 sps:$4 sm:$0xff]  }
 0x1b9   :  { %2458 = vmatprep.subr.bf16.mxu0 %v4463_v59  ;;  %v4575_v59 = vld [vmem:[#allocation6 + $0x30] ss:$8 sps:$4 sm:$0xff]  }
 0x1bc   :  { %2459 = vmatpush1.bf16.msra.mxu0 %v4461_v60  ;;  %v4580_v60 = vld [vmem:[#allocation6 + $0x24] ss:$8 sps:$4 sm:$0xff]  }
 0x1bd   :  { %2460 = vmatprep.subr.bf16.mxu0 %v4469_v61  ;;  %v4533_v61 = vld [vmem:[#allocation4 + $0x228] ss:$16 sps:$4 sm:$0xff]  }
 0x1c0   :  { %2461 = vmatpush2.bf16.msra.mxu0 %v4467_v62  ;;  %v4538_v62 = vld [vmem:[#allocation4 + $0x20c] ss:$16 sps:$4 sm:$0xff]  }
 0x1c1   :  { %2462 = vmatprep.subr.bf16.mxu0 %v4475_v63  ;;  %v4578_v63 = vld [vmem:[#allocation6 + $0x20] ss:$8 sps:$4 sm:$0xff]  }
 0x1c4   :  { %2463 = vmatpush2.bf16.msra.mxu0 %v4473_v0  ;;  %v4583_v0 = vld [vmem:[#allocation6 + $0x14] ss:$8 sps:$4 sm:$0xff]  }
 0x1c5   :  { %2464 = vmatprep.subr.bf16.mxu0 %v4481_v1  ;;  %v4536_v1 = vld [vmem:[#allocation4 + $0x208] ss:$16 sps:$4 sm:$0xff]  }
 0x1c8   :  { %2465 = vmatpush2.bf16.msra.mxu0 %v4479_v2  ;;  %v4541_v2 = vld [vmem:[#allocation4 + $0x3ec] ss:$16 sps:$4 sm:$0xff]  }
 0x1c9   :  { %2466 = vmatprep.subr.bf16.mxu0 %v4487_v3  ;;  %v4581_v3 = vld [vmem:[#allocation6 + $0x10] ss:$8 sps:$4 sm:$0xff]  }
 0x1cc   :  { %2467 = vmatpush2.bf16.msra.mxu0 %v4485_v4  ;;  %v4586_v4 = vld [vmem:[#allocation6 + $0x4] ss:$8 sps:$4 sm:$0xff]  }
 0x1cd   :  { %2468 = vmatprep.subr.bf16.mxu0 %v4493_v5  ;;  %v4539_v5 = vld [vmem:[#allocation4 + $0x3e8] ss:$16 sps:$4 sm:$0xff]  }
 0x1d0   :  { %2469 = vmatpush2.bf16.msra.mxu0 %v4491_v8  ;;  %v4544_v8 = vld [vmem:[#allocation4 + $0x3cc] ss:$16 sps:$4 sm:$0xff]  }
 0x1d1   :  { %2470 = vmatprep.subr.bf16.mxu0 %v4499_v10  ;;  %v4584_v10 = vld [vmem:[#allocation6] ss:$8 sps:$4 sm:$0xff]  }
 0x1d4   :  { %2471 = vmatpush2.bf16.msra.mxu0 %v4497_v14  ;;  %v4542_v14 = vld [vmem:[#allocation4 + $0x3c8] ss:$16 sps:$4 sm:$0xff]  }
 0x1d5   :  { %v1522_v19 = vpop.f32.mrf.mxu0  ;;  %2472 = vmatprep.subr.bf16.mxu0 %v4505_v15  ;;  %v4547_v15 = vld [vmem:[#allocation4 + $0x3ac] ss:$16 sps:$4 sm:$0xff]  }
 0x1d6   :  { %v1563_v20 = vpop.f32.mrf.mxu1  ;;  %v1523_v23 = vadd.f32 %v1522_v19, %v1482_v17  ;;  %v4592_v17 = vld [vmem:[#allocation6 + $0xe4] ss:$8 sps:$4 sm:$0xff]  }
 0x1d7   :  { %v1524_v24 = vpop.f32.mrf.mxu0  ;;  %v4550_v19 = vld [vmem:[#allocation4 + $0x38c] ss:$16 sps:$4 sm:$0xff]  }
 0x1d8   :  { %v1565_v26 = vpop.f32.mrf.mxu1  ;;  %v1564_v27 = vadd.f32 %v1563_v20, %v1523_v23  ;;  %v1525_v28 = vadd.f32 %v1524_v24, %v1484_v22  ;;  %2473 = vmatpush2.bf16.msra.mxu0 %v4503_v18  ;;  %v4545_v18 = vld [vmem:[#allocation4 + $0x3a8] ss:$16 sps:$4 sm:$0xff]   ;;  %v4553_v23 = vld [vmem:[#allocation4 + $0x36c] ss:$16 sps:$4 sm:$0xff]  }
 0x1d9   :  { %v1526_v51 = vpop.f32.mrf.mxu0  ;;  %2474 = vmatprep.subr.bf16.mxu0 %v4511_v21  ;;  %v4590_v20 = vld [vmem:[#allocation6 + $0xe0] ss:$8 sps:$4 sm:$0xff]   ;;  %v4595_v21 = vld [vmem:[#allocation6 + $0xd4] ss:$8 sps:$4 sm:$0xff]   ;;  %v4593_v24 = vld [vmem:[#allocation6 + $0xd0] ss:$8 sps:$4 sm:$0xff]  }
 0x1da   :  { %v1567_v30 = vpop.f32.mrf.mxu1  ;;  %v1566_v6 = vadd.f32 %v1565_v26, %v1525_v28  ;;  %v1572_v31 = vmax.f32 %v1564_v27, 0.0  ;;  %v4548_v22 = vld [vmem:[#allocation4 + $0x388] ss:$16 sps:$4 sm:$0xff]   ;;  %v4598_v26 = vld [vmem:[#allocation6 + $0xc4] ss:$8 sps:$4 sm:$0xff]  }
 0x1db   :  { %v1527_v32 = vpop.f32.mrf.mxu0  ;;  %v4551_v27 = vld [vmem:[#allocation4 + $0x368] ss:$16 sps:$4 sm:$0xff]   ;;  %v4556_v28 = vld [vmem:[#allocation4 + $0x34c] ss:$16 sps:$4 sm:$0xff]  }
 0x1dc   :  { %v1568_v33 = vpop.f32.mrf.mxu1  ;;  %v1573_v34 = vmax.f32 %v1566_v6, 0.0  ;;  %2475 = vmatpush2.bf16.msra.mxu0 %v4509_v29  ;;  %v5032_v38 = vpack.c.bf16 %v1572_v31, %v1572_v31  ;;  %v4596_v29 = vld [vmem:[#allocation6 + $0xc0] ss:$8 sps:$4 sm:$0xff]   ;;  %v4601_v51 = vld [vmem:[#allocation6 + $0xb4] ss:$8 sps:$4 sm:$0xff]  }
 0x1dd   :  { %2926 = vmatprep.subr.bf16.mxu0 %v4565_v42  ;;  %v4554_v30 = vld [vmem:[#allocation4 + $0x348] ss:$16 sps:$4 sm:$0xff]   ;;  %v4559_v6 = vld [vmem:[#allocation4 + $0x32c] ss:$16 sps:$4 sm:$0xff]  }
 0x1de   :  { %v1577_v36 = vpack.c.bf16 %v1573_v34, %v1573_v34  ;;  %v4599_v31 = vld [vmem:[#allocation6 + $0xb0] ss:$8 sps:$4 sm:$0xff]   ;;  %v4562_v33 = vld [vmem:[#allocation4 + $0x30c] ss:$16 sps:$4 sm:$0xff]  }
 0x1df   :  { %2477 = vmatmul.mubr.bf16.vlgmr.msra.gmra.mxu0 %v5013_v45  ;;  %v4571_v45 = vld [vmem:[#allocation6 + $0x54] ss:$8 sps:$4 sm:$0xff]   ;;  %v4557_v32 = vld [vmem:[#allocation4 + $0x328] ss:$16 sps:$4 sm:$0xff]  }
 0x1e0   :  { %2435 = vmatprep.mubr.bf16.mxu1 %v1577_v36  ;;  %2927 = vmatpush1.bf16.msra.mxu0 %v4563_v41  ;;  %v4560_v34 = vld [vmem:[#allocation4 + $0x308] ss:$16 sps:$4 sm:$0xff]   ;;  %v4613_v42 = vld [vmem:[#allocation6 + $0x174] ss:$8 sps:$4 sm:$0xff]  }
 0x1e1   :  { %2436 = vmatmul.mubr.bf16.vlgmr.msra.gmra.mxu1 %v5032_v38  ;;  %2928 = vmatprep.subr.bf16.mxu0 %v4568_v44  ;;  %v4608_v41 = vld [vmem:[#allocation6 + $0x80] ss:$8 sps:$4 sm:$0xff]   ;;  %v4616_v44 = vld [vmem:[#allocation6 + $0x164] ss:$8 sps:$4 sm:$0xff]  }
 0x1e2   :  { %2486 = vmatpush1.bf16.msra.mxu1 %v4515_v37  ;;  %2517 = vmatprep.mubr.bf16.mxu1 %v1577_v36  ;;  %v4604_v36 = vld [vmem:[#allocation6 + $0xa4] ss:$8 sps:$4 sm:$0xff]   ;;  %v4602_v37 = vld [vmem:[#allocation6 + $0xa0] ss:$8 sps:$4 sm:$0xff]  }
 0x1e3   :  { %2487 = vmatprep.subr.bf16.mxu1 %v4520_v35  ;;  %v4607_v35 = vld [vmem:[#allocation6 + $0x94] ss:$8 sps:$4 sm:$0xff]  }
 0x1e4   :  { %2929 = vmatpush1.bf16.msra.mxu0 %v4566_v47  ;;  %v4619_v47 = vld [vmem:[#allocation6 + $0x154] ss:$8 sps:$4 sm:$0xff]  }
 0x1e5   :  { %2930 = vmatprep.subr.bf16.mxu0 %v4571_v45  ;;  %v4617_v45 = vld [vmem:[#allocation6 + $0x150] ss:$8 sps:$4 sm:$0xff]  }
 0x1e6   :  { %2488 = vmatpush1.bf16.msra.mxu1 %v4518_v39  ;;  %v4605_v39 = vld [vmem:[#allocation6 + $0x90] ss:$8 sps:$4 sm:$0xff]  }
 0x1e7   :  { %2489 = vmatprep.subr.bf16.mxu1 %v4523_v40  ;;  %v4610_v40 = vld [vmem:[#allocation6 + $0x84] ss:$8 sps:$4 sm:$0xff]  }
 0x1e8   :  { %2931 = vmatpush1.bf16.msra.mxu0 %v4569_v50  ;;  %v4623_v50 = vld [vmem:[#allocation6 + $0x130] ss:$8 sps:$4 sm:$0xff]  }
 0x1e9   :  { %2932 = vmatprep.subr.bf16.mxu0 %v4574_v52  ;;  %v4628_v52 = vld [vmem:[#allocation6 + $0x124] ss:$8 sps:$4 sm:$0xff]  }
 0x1ea   :  { %2490 = vmatpush1.bf16.msra.mxu1 %v4521_v43  ;;  %v4611_v43 = vld [vmem:[#allocation6 + $0x170] ss:$8 sps:$4 sm:$0xff]  }
 0x1eb   :  { %2491 = vmatprep.subr.bf16.mxu1 %v4526_v46  ;;  %v4614_v46 = vld [vmem:[#allocation6 + $0x160] ss:$8 sps:$4 sm:$0xff]  }
 0x1ec   :  { %2933 = vmatpush1.bf16.msra.mxu0 %v4572_v55  ;;  %v4629_v55 = vld [vmem:[#allocation6 + $0x110] ss:$8 sps:$4 sm:$0xff]  }
 0x1ed   :  { %2934 = vmatprep.subr.bf16.mxu0 %v4577_v56  ;;  %v4634_v56 = vld [vmem:[#allocation6 + $0x104] ss:$8 sps:$4 sm:$0xff]  }
 0x1ee   :  { %2492 = vmatpush1.bf16.msra.mxu1 %v4524_v48  ;;  %v4620_v48 = vld [vmem:[#allocation6 + $0x140] ss:$8 sps:$4 sm:$0xff]  }
 0x1ef   :  { %2493 = vmatprep.subr.bf16.mxu1 %v4529_v49  ;;  %v4625_v49 = vld [vmem:[#allocation6 + $0x134] ss:$8 sps:$4 sm:$0xff]  }
 0x1f0   :  { %2935 = vmatpush1.bf16.msra.mxu0 %v4575_v59  ;;  %v4635_v59 = vld [vmem:[#allocation6 + $0x1f0] ss:$8 sps:$4 sm:$0xff]  }
 0x1f1   :  { %2936 = vmatprep.subr.bf16.mxu0 %v4580_v60  ;;  %v4640_v60 = vld [vmem:[#allocation6 + $0x1e4] ss:$8 sps:$4 sm:$0xff]  }
 0x1f2   :  { %2494 = vmatpush1.bf16.msra.mxu1 %v4527_v53  ;;  %v4626_v53 = vld [vmem:[#allocation6 + $0x120] ss:$8 sps:$4 sm:$0xff]  }
 0x1f3   :  { %2495 = vmatprep.subr.bf16.mxu1 %v4532_v54  ;;  %v4631_v54 = vld [vmem:[#allocation6 + $0x114] ss:$8 sps:$4 sm:$0xff]  }
 0x1f4   :  { %2937 = vmatpush1.bf16.msra.mxu0 %v4578_v63  ;;  %v4641_v63 = vld [vmem:[#allocation6 + $0x1d0] ss:$8 sps:$4 sm:$0xff]  }
 0x1f5   :  { %2938 = vmatprep.subr.bf16.mxu0 %v4583_v0  ;;  %v4646_v0 = vld [vmem:[#allocation6 + $0x1c4] ss:$8 sps:$4 sm:$0xff]  }
 0x1f6   :  { %2496 = vmatpush1.bf16.msra.mxu1 %v4530_v57  ;;  %v4632_v57 = vld [vmem:[#allocation6 + $0x100] ss:$8 sps:$4 sm:$0xff]  }
 0x1f7   :  { %2497 = vmatprep.subr.bf16.mxu1 %v4535_v58  ;;  %v4637_v58 = vld [vmem:[#allocation6 + $0x1f4] ss:$8 sps:$4 sm:$0xff]  }
 0x1f8   :  { %2939 = vmatpush1.bf16.msra.mxu0 %v4581_v3  ;;  %v4647_v3 = vld [vmem:[#allocation6 + $0x1b0] ss:$8 sps:$4 sm:$0xff]  }
 0x1f9   :  { %2940 = vmatprep.subr.bf16.mxu0 %v4586_v4  ;;  %v4652_v4 = vld [vmem:[#allocation6 + $0x1a4] ss:$8 sps:$4 sm:$0xff]  }
 0x1fa   :  { %2498 = vmatpush1.bf16.msra.mxu1 %v4533_v61  ;;  %v4638_v61 = vld [vmem:[#allocation6 + $0x1e0] ss:$8 sps:$4 sm:$0xff]  }
 0x1fb   :  { %2499 = vmatprep.subr.bf16.mxu1 %v4538_v62  ;;  %v4643_v62 = vld [vmem:[#allocation6 + $0x1d4] ss:$8 sps:$4 sm:$0xff]  }
 0x1fc   :  { %2941 = vmatpush1.bf16.msra.mxu0 %v4584_v10 }
 0x1fd   :  { %2942 = vmatprep.subr.bf16.mxu0 %v4589_v12  ;;  %v4655_v12 = vld [vmem:[#allocation6 + $0x194] ss:$8 sps:$4 sm:$0xff]  }
 0x1fe   :  { %2500 = vmatpush1.bf16.msra.mxu1 %v4536_v1  ;;  %v4644_v1 = vld [vmem:[#allocation6 + $0x1c0] ss:$8 sps:$4 sm:$0xff]  }
 0x1ff   :  { %2501 = vmatprep.subr.bf16.mxu1 %v4541_v2  ;;  %v4649_v2 = vld [vmem:[#allocation6 + $0x1b4] ss:$8 sps:$4 sm:$0xff]  }
 0x200   :  { %2943 = vmatpush2.bf16.msra.mxu0 %v4587_v16 }
 0x201   :  { %2944 = vmatprep.subr.bf16.mxu0 %v4592_v17  ;;  %v4658_v17 = vld [vmem:[#allocation6 + $0x184] ss:$8 sps:$4 sm:$0xff]  }
 0x202   :  { %2502 = vmatpush2.bf16.msra.mxu1 %v4539_v5  ;;  %v4650_v5 = vld [vmem:[#allocation6 + $0x1a0] ss:$8 sps:$4 sm:$0xff]  }
 0x203   :  { %2503 = vmatprep.subr.bf16.mxu1 %v4544_v8 }
 0x204   :  { %2945 = vmatpush2.bf16.msra.mxu0 %v4590_v20 }
 0x205   :  { %2946 = vmatprep.subr.bf16.mxu0 %v4595_v21 }
 0x206   :  { %2504 = vmatpush2.bf16.msra.mxu1 %v4542_v14  ;;  %v4653_v14 = vld [vmem:[#allocation6 + $0x190] ss:$8 sps:$4 sm:$0xff]  }
 0x207   :  { %2505 = vmatprep.subr.bf16.mxu1 %v4547_v15 }
 0x208   :  { %2947 = vmatpush2.bf16.msra.mxu0 %v4593_v24 }
 0x209   :  { %2948 = vmatprep.subr.bf16.mxu0 %v4598_v26 }
 0x20a   :  { %2506 = vmatpush2.bf16.msra.mxu1 %v4545_v18  ;;  %v4656_v18 = vld [vmem:[#allocation6 + $0x180] ss:$8 sps:$4 sm:$0xff]  }
 0x20b   :  { %2507 = vmatprep.subr.bf16.mxu1 %v4550_v19  ;;  %v1708_v19 = vsub.s32 1, %v4990_v25 }
 0x20c   :  { %2949 = vmatpush2.bf16.msra.mxu0 %v4596_v29 }
 0x20d   :  { %2950 = vmatprep.subr.bf16.mxu0 %v4601_v51  ;;  %v1709_v20 = vrot.slane %v4998_v7, %v1708_v19  ;;  %v1713_v21 = vrot.slane %v5003_v13, %v1708_v19 }
 0x20e   :  { %2508 = vmatpush2.bf16.msra.mxu1 %v4548_v22 }
 0x20f   :  { %2509 = vmatprep.subr.bf16.mxu1 %v4553_v23 }
 0x210   :  { %2951 = vmatpush2.bf16.msra.mxu0 %v4599_v31 }
 0x211   :  { %2952 = vmatprep.subr.bf16.mxu0 %v4604_v36 }
 0x212   :  { %2510 = vmatpush2.bf16.msra.mxu1 %v4551_v27 }
 0x213   :  { %2511 = vmatprep.subr.bf16.mxu1 %v4556_v28 }
 0x214   :  { %2953 = vmatpush2.bf16.msra.mxu0 %v4602_v37 }
 0x215   :  { %2954 = vmatprep.subr.bf16.mxu0 %v4607_v35  ;;  %v1717_v35 = vrot.slane %v5019_v9, %v1708_v19  ;;  %v4662_v9 = vld [vmem:[#allocation7 + $0x30] sm:$0xff]  }
 0x216   :  { %2512 = vmatpush2.bf16.msra.mxu1 %v4554_v30 }
 0x217   :  { %2513 = vmatprep.subr.bf16.mxu1 %v4559_v6 }
 0x218   :  { %2955 = vmatpush2.bf16.msra.mxu0 %v4605_v39  ;;  %v1721_v39 = vrot.slane %v5024_v11, %v1708_v19  ;;  %v4663_v11 = vld [vmem:[#allocation7 + $0x68] sm:$0xff]  }
 0x219   :  { %2956 = vmatprep.subr.bf16.mxu0 %v4610_v40 }
 0x21a   :  { %2514 = vmatpush2.bf16.msra.mxu1 %v4557_v32 }
 0x21b   :  { %2515 = vmatprep.subr.bf16.mxu1 %v4562_v33 }
 0x21c   :  { %2957 = vmatpush2.bf16.msra.mxu0 %v4608_v41 }
 0x21e   :  { %2516 = vmatpush2.bf16.msra.mxu1 %v4560_v34 }
 0x21f   :  { %2967 = vmatprep.subr.bf16.mxu1 %v4613_v42 }
 0x221   :  { %2518 = vmatmul.mubr.bf16.vlgmr.msra.gmra.mxu1 %v5032_v38  ;;  %v4622_v38 = vld [vmem:[#allocation6 + $0x144] ss:$8 sps:$4 sm:$0xff]  }
 0x222   :  { %2968 = vmatpush1.bf16.msra.mxu1 %v4611_v43 }
 0x223   :  { %2969 = vmatprep.subr.bf16.mxu1 %v4616_v44 }
 0x226   :  { %2970 = vmatpush1.bf16.msra.mxu1 %v4614_v46 }
 0x227   :  { %2971 = vmatprep.subr.bf16.mxu1 %v4619_v47 }
 0x22a   :  { %2972 = vmatpush1.bf16.msra.mxu1 %v4617_v45 }
 0x22b   :  { %2973 = vmatprep.subr.bf16.mxu1 %v4622_v38 }
 0x22e   :  { %2974 = vmatpush1.bf16.msra.mxu1 %v4620_v48 }
 0x22f   :  { %2975 = vmatprep.subr.bf16.mxu1 %v4625_v49 }
 0x232   :  { %2976 = vmatpush1.bf16.msra.mxu1 %v4623_v50 }
 0x233   :  { %2977 = vmatprep.subr.bf16.mxu1 %v4628_v52  ;;  %v4659_v52 = vld [vmem:[#allocation7 + $0x78] sm:$0xff]  }
 0x234   :  { %3953 = vmatprep.subr.bf16.mxu0 %v4659_v52  ;;  %v4691_v52 = vld [vmem:[#allocation12 + $0x38] sm:$0xff]  }
 0x236   :  { %2978 = vmatpush1.bf16.msra.mxu1 %v4626_v53  ;;  %v4660_v53 = vld [vmem:[#allocation7 + $0x38] sm:$0xff]  }
 0x237   :  { %2979 = vmatprep.subr.bf16.mxu1 %v4631_v54  ;;  %v4661_v54 = vld [vmem:[#allocation7 + $0x70] sm:$0xff]  }
 0x23a   :  { %2980 = vmatpush1.bf16.msra.mxu1 %v4629_v55  ;;  %v4664_v55 = vld [vmem:[#allocation7 + $0x28] sm:$0xff]  }
 0x23b   :  { %2981 = vmatprep.subr.bf16.mxu1 %v4634_v56  ;;  %v4665_v56 = vld [vmem:[#allocation7 + $0x60] sm:$0xff]  }
 0x23e   :  { %2982 = vmatpush1.bf16.msra.mxu1 %v4632_v57  ;;  %v4666_v57 = vld [vmem:[#allocation7 + $0x20] sm:$0xff]  }
 0x23f   :  { %2983 = vmatprep.subr.bf16.mxu1 %v4637_v58  ;;  %v4667_v58 = vld [vmem:[#allocation7 + $0x58] sm:$0xff]  }
 0x242   :  { %2984 = vmatpush2.bf16.msra.mxu1 %v4635_v59  ;;  %v4668_v59 = vld [vmem:[#allocation7 + $0x18] sm:$0xff]  }
 0x243   :  { %2985 = vmatprep.subr.bf16.mxu1 %v4640_v60  ;;  %v4669_v60 = vld [vmem:[#allocation7 + $0x50] sm:$0xff]  }
 0x246   :  { %2986 = vmatpush2.bf16.msra.mxu1 %v4638_v61  ;;  %v4670_v61 = vld [vmem:[#allocation7 + $0x10] sm:$0xff]  }
 0x247   :  { %2987 = vmatprep.subr.bf16.mxu1 %v4643_v62  ;;  %v4671_v62 = vld [vmem:[#allocation7 + $0x48] sm:$0xff]  }
 0x24a   :  { %2988 = vmatpush2.bf16.msra.mxu1 %v4641_v63  ;;  %v4672_v63 = vld [vmem:[#allocation7 + $0x8] sm:$0xff]  }
 0x24b   :  { %2989 = vmatprep.subr.bf16.mxu1 %v4646_v0  ;;  %v4673_v0 = vld [vmem:[#allocation7 + $0x40] sm:$0xff]  }
 0x24e   :  { %2990 = vmatpush2.bf16.msra.mxu1 %v4644_v1  ;;  %v4674_v1 = vld [vmem:[#allocation7] sm:$0xff]  }
 0x24f   :  { %2991 = vmatprep.subr.bf16.mxu1 %v4649_v2  ;;  %v4675_v2 = vld [vmem:[#allocation9 + $0x38] sm:$0xff]  }
 0x252   :  { %2992 = vmatpush2.bf16.msra.mxu1 %v4647_v3  ;;  %v4860_v3 = vmov 0.0  }
 0x253   :  { %2993 = vmatprep.subr.bf16.mxu1 %v4652_v4  ;;  %v4676_v4 = vld [vmem:[#allocation9 + $0x30] sm:$0xff]  }
 0x256   :  { %2994 = vmatpush2.bf16.msra.mxu1 %v4650_v5  ;;  %v4677_v5 = vld [vmem:[#allocation9 + $0x28] sm:$0xff]  }
 0x257   :  { %2995 = vmatprep.subr.bf16.mxu1 %v4655_v12 }
 0x25a   :  { %2996 = vmatpush2.bf16.msra.mxu1 %v4653_v14 }
 0x25b   :  { %2997 = vmatprep.subr.bf16.mxu1 %v4658_v17  ;;  %v2600_v17 = vsub.s32 2, %v4990_v25 }
 0x25d   :  { %v2605_v19 = vrot.slane %v5003_v13, %v2600_v17  ;;  %v4682_v13 = vld [vmem:[#allocation9] sm:$0xff]  }
 0x25e   :  { %2998 = vmatpush2.bf16.msra.mxu1 %v4656_v18  ;;  %v2601_v18 = vrot.slane %v4998_v7, %v2600_v17 }
 0x25f   :  { %v2396_v8 = vpop.f32.mrf.mxu0  ;;  %4002 = vmatprep.subr.bf16.mxu1 %v4860_v3 }
 0x260   :  { %v2397_v23 = vadd.f32 %v2396_v8, %v1709_v20  ;;  %v4678_v8 = vld [vmem:[#allocation9 + $0x20] sm:$0xff]  }
 0x261   :  { %v2398_v10 = vpop.f32.mrf.mxu0 }
 0x262   :  { %v2399_v27 = vadd.f32 %v2398_v10, %v1713_v21  ;;  %v4679_v10 = vld [vmem:[#allocation9 + $0x18] sm:$0xff]  }
 0x263   :  { %v2400_v15 = vpop.f32.mrf.mxu0 }
 0x265   :  { %v2401_v16 = vpop.f32.mrf.mxu0 }
 0x29f   :  { %v2478_v22 = vpop.f32.mrf.mxu0 }
 0x2a0   :  { %v2479_v40 = vadd.f32 %v2478_v22, %v1717_v35  ;;  %v4687_v35 = vld [vmem:[#allocation10 + $0x18] sm:$0xff]  }
 0x2a1   :  { %v2480_v24 = vpop.f32.mrf.mxu0  ;;  %v2437_v26 = vpop.f32.mrf.mxu1 }
 0x2a2   :  { %v2438_v28 = vadd.f32 %v2437_v26, %v2397_v23  ;;  %v2481_v42 = vadd.f32 %v2480_v24, %v1721_v39  ;;  %v4688_v39 = vld [vmem:[#allocation10 + $0x10] sm:$0xff]  }
 0x2a3   :  { %v2482_v29 = vpop.f32.mrf.mxu0  ;;  %v2439_v51 = vpop.f32.mrf.mxu1 }
 0x2a4   :  { %v2440_v30 = vadd.f32 %v2439_v51, %v2399_v27  ;;  %v2526_v6 = vmax.f32 %v2438_v28, 0.0 }
 0x2a5   :  { %v2483_v31 = vpop.f32.mrf.mxu0  ;;  %v2441_v32 = vpop.f32.mrf.mxu1 }
 0x2a6   :  { %v2527_v33 = vmax.f32 %v2440_v30, 0.0  ;;  %v2530_v37 = vpack.c.bf16 %v2526_v6, %v2526_v6  ;;  %v4680_v31 = vld [vmem:[#allocation9 + $0x10] sm:$0xff]   ;;  %v4681_v32 = vld [vmem:[#allocation9 + $0x8] sm:$0xff]  }
 0x2a7   :  { %v2442_v34 = vpop.f32.mrf.mxu1 }
 0x2a8   :  { %v2531_v36 = vpack.c.bf16 %v2527_v33, %v2527_v33  ;;  %v4683_v33 = vld [vmem:[#allocation10 + $0x38] sm:$0xff]   ;;  %v4684_v34 = vld [vmem:[#allocation10 + $0x30] sm:$0xff]  }
 0x2aa   :  { %2958 = vmatprep.mubr.bf16.mxu0 %v2531_v36  ;;  %v4685_v36 = vld [vmem:[#allocation10 + $0x28] sm:$0xff]  }
 0x2ab   :  { %2959 = vmatmul.mubr.bf16.vlgmr.msra.gmra.mxu0 %v2530_v37  ;;  %v4686_v37 = vld [vmem:[#allocation10 + $0x20] sm:$0xff]  }
 0x2ac   :  { %3954 = vmatpush3.bf16.msra.mxu0 %v4660_v53  ;;  %v4692_v53 = vld [vmem:[#allocation12 + $0x30] sm:$0xff]  }
 0x2ad   :  { %3955 = vmatprep.subr.bf16.mxu0 %v4661_v54  ;;  %v4693_v54 = vld [vmem:[#allocation12 + $0x28] sm:$0xff]  }
 0x2b0   :  { %3956 = vmatpush3.bf16.msra.mxu0 %v4662_v9  ;;  %v4694_v9 = vld [vmem:[#allocation12 + $0x20] sm:$0xff]  }
 0x2b1   :  { %3957 = vmatprep.subr.bf16.mxu0 %v4663_v11  ;;  %v4695_v11 = vld [vmem:[#allocation12 + $0x18] sm:$0xff]  }
 0x2b4   :  { %3958 = vmatpush3.bf16.msra.mxu0 %v4664_v55  ;;  %v4696_v55 = vld [vmem:[#allocation12 + $0x10] sm:$0xff]  }
 0x2b5   :  { %3959 = vmatprep.subr.bf16.mxu0 %v4665_v56  ;;  %v3204_v56 = vsub.s32 4, %v4990_v25 }
 0x2b8   :  { %3960 = vmatpush3.bf16.msra.mxu0 %v4666_v57  ;;  %v3205_v57 = vrot.slane %v4998_v7, %v3204_v56 }
 0x2b9   :  { %3961 = vmatprep.subr.bf16.mxu0 %v4667_v58 }
 0x2bc   :  { %3962 = vmatpush3.bf16.msra.mxu0 %v4668_v59 }
 0x2bd   :  { %3963 = vmatprep.subr.bf16.mxu0 %v4669_v60 }
 0x2c0   :  { %3964 = vmatpush3.bf16.msra.mxu0 %v4670_v61 }
 0x2c1   :  { %3965 = vmatprep.subr.bf16.mxu0 %v4671_v62 }
 0x2c4   :  { %3966 = vmatpush3.bf16.msra.mxu0 %v4672_v63 }
 0x2c5   :  { %3967 = vmatprep.subr.bf16.mxu0 %v4673_v0 }
 0x2c8   :  { %3968 = vmatpush3.bf16.msra.mxu0 %v4674_v1  ;;  %v4697_v1 = vld [vmem:[#allocation12 + $0x8] sm:$0xff]  }
 0x2c9   :  { %4022 = vmatprep.subr.bf16.mxu0 %v4860_v3 }
 0x2e1   :  { %v2519_v41 = vpop.f32.mrf.mxu1 }
 0x2e2   :  { %v2520_v43 = vadd.f32 %v2519_v41, %v2479_v40  ;;  %v3046_v40 = vsub.s32 3, %v4990_v25 }
 0x2e3   :  { %v2521_v44 = vpop.f32.mrf.mxu1 }
 0x2e4   :  { %v2522_v46 = vadd.f32 %v2521_v44, %v2481_v42  ;;  %v2528_v47 = vmax.f32 %v2520_v43, 0.0  ;;  %v3047_v42 = vrot.slane %v4998_v7, %v3046_v40 }
 0x2e5   :  { %v2523_v45 = vpop.f32.mrf.mxu1 }
 0x2e6   :  { %v2529_v38 = vmax.f32 %v2522_v46, 0.0  ;;  %v2532_v50 = vpack.c.bf16 %v2528_v47, %v2528_v47 }
 0x2e7   :  { %v2524_v48 = vpop.f32.mrf.mxu1 }
 0x2e8   :  { %v2533_v49 = vpack.c.bf16 %v2529_v38, %v2529_v38 }
 0x2ea   :  { %2999 = vmatprep.mubr.bf16.mxu1 %v2533_v49  ;;  %v4689_v49 = vld [vmem:[#allocation10 + $0x8] sm:$0xff]  }
 0x2eb   :  { %3000 = vmatmul.mubr.bf16.vlgmr.msra.gmra.mxu1 %v2532_v50  ;;  %v4690_v50 = vld [vmem:[#allocation10] sm:$0xff]  }
 0x2ec   :  { %4003 = vmatpush3.bf16.msra.mxu1 %v4675_v2  ;;  %4018 = vmatprep.mubr.msk.bf16.mxu1 %vm4861_vm0, %v4860_v3  ;;  %v4698_v2 = vld [vmem:[#allocation12] sm:$0xff]  }
 0x2ed   :  { %4004 = vmatprep.subr.bf16.mxu1 %v4860_v3 }
 0x2f0   :  { %4005 = vmatpush3.bf16.msra.mxu1 %v4676_v4  ;;  %v3314_v4 = vsub.s32 5, %v4990_v25 }
 0x2f1   :  { %4006 = vmatprep.subr.bf16.mxu1 %v4860_v3 }
 0x2f4   :  { %4007 = vmatpush3.bf16.msra.mxu1 %v4677_v5  ;;  %v3315_v5 = vrot.slane %v4998_v7, %v3314_v4 }
 0x2f5   :  { %4008 = vmatprep.subr.bf16.mxu1 %v4860_v3 }
 0x2f8   :  { %4009 = vmatpush3.bf16.msra.mxu1 %v4678_v8 }
 0x2f9   :  { %4010 = vmatprep.subr.bf16.mxu1 %v4860_v3 }
 0x2fc   :  { %4011 = vmatpush3.bf16.msra.mxu1 %v4679_v10 }
 0x2fd   :  { %4012 = vmatprep.subr.bf16.mxu1 %v4860_v3 }
 0x300   :  { %4013 = vmatpush3.bf16.msra.mxu1 %v4680_v31 }
 0x301   :  { %4014 = vmatprep.subr.bf16.mxu1 %v4860_v3 }
 0x304   :  { %4015 = vmatpush3.bf16.msra.mxu1 %v4681_v32 }
 0x305   :  { %4016 = vmatprep.subr.bf16.mxu1 %v4860_v3 }
 0x308   :  { %4017 = vmatpush3.bf16.msra.mxu1 %v4682_v13 }
 0x309   :  { %4042 = vmatprep.subr.bf16.mxu1 %v4860_v3 }
 0x36b   :  { %v2960_v12 = vpop.f32.mrf.mxu0 }
 0x36c   :  { %v2961_v20 = vadd.f32 %v2960_v12, %v2601_v18  ;;  %v3424_v18 = vsub.s32 6, %v4990_v25 }
 0x36d   :  { %v2962_v14 = vpop.f32.mrf.mxu0 }
 0x36e   :  { %v2963_v22 = vadd.f32 %v2962_v14, %v2605_v19  ;;  %v3425_v19 = vrot.slane %v4998_v7, %v3424_v18 }
 0x36f   :  { %v2964_v15 = vpop.f32.mrf.mxu0 }
 0x371   :  { %v2965_v16 = vpop.f32.mrf.mxu0 }
 0x3ab   :  { %v3001_v21 = vpop.f32.mrf.mxu1 }
 0x3ac   :  { %v3002_v23 = vadd.f32 %v3001_v21, %v2961_v20 }
 0x3ad   :  { %v3003_v24 = vpop.f32.mrf.mxu1 }
 0x3ae   :  { %v3004_v26 = vadd.f32 %v3003_v24, %v2963_v22  ;;  %v3008_v27 = vmax.f32 %v3002_v23, 0.0 }
 0x3af   :  { %v3005_v28 = vpop.f32.mrf.mxu1 }
 0x3b0   :  { %v3009_v29 = vmax.f32 %v3004_v26, 0.0  ;;  %v3010_v6 = vpack.c.bf16 %v3008_v27, %v3008_v27 }
 0x3b1   :  { %v3006_v51 = vpop.f32.mrf.mxu1 }
 0x3b2   :  { %v3011_v30 = vpack.c.bf16 %v3009_v29, %v3009_v29 }
 0x3b4   :  { %3176 = vmatprep.mubr.bf16.mxu0 %v3011_v30 }
 0x3b5   :  { %3177 = vmatmul.mubr.bf16.vlgmr.msra.gmra.mxu0 %v3010_v6 }
 0x3b6   :  { %4038 = vmatprep.mubr.msk.bf16.mxu0 %vm4861_vm0, %v4860_v3  ;;  %4023 = vmatpush3.bf16.msra.mxu0 %v4683_v33 }
 0x3b7   :  { %4024 = vmatprep.subr.bf16.mxu0 %v4860_v3 }
 0x3ba   :  { %4025 = vmatpush3.bf16.msra.mxu0 %v4684_v34 }
 0x3bb   :  { %4026 = vmatprep.subr.bf16.mxu0 %v4860_v3 }
 0x3be   :  { %4027 = vmatpush3.bf16.msra.mxu0 %v4685_v36 }
 0x3bf   :  { %4028 = vmatprep.subr.bf16.mxu0 %v4860_v3 }
 0x3c2   :  { %4029 = vmatpush3.bf16.msra.mxu0 %v4686_v37 }
 0x3c3   :  { %4030 = vmatprep.subr.bf16.mxu0 %v4860_v3 }
 0x3c6   :  { %4031 = vmatpush3.bf16.msra.mxu0 %v4687_v35 }
 0x3c7   :  { %4032 = vmatprep.subr.bf16.mxu0 %v4860_v3 }
 0x3ca   :  { %4033 = vmatpush3.bf16.msra.mxu0 %v4688_v39 }
 0x3cb   :  { %4034 = vmatprep.subr.bf16.mxu0 %v4860_v3 }
 0x3ce   :  { %4035 = vmatpush3.bf16.msra.mxu0 %v4689_v49 }
 0x3cf   :  { %4036 = vmatprep.subr.bf16.mxu0 %v4860_v3 }
 0x3d2   :  { %4037 = vmatpush3.bf16.msra.mxu0 %v4690_v50 }
 0x475   :  { %v3969_v41 = vpop.f32.mrf.mxu0 }
 0x477   :  { %v3970_v43 = vpop.f32.mrf.mxu0 }
 0x478   :  { %v3971_v44 = vadd.f32 %v3970_v43, %v3969_v41 }
 0x479   :  { %v3972_v46 = vpop.f32.mrf.mxu0 }
 0x47a   :  { %v3179_v47 = vadd.f32 %v3971_v44, %v3047_v42 }
 0x47b   :  { %v3973_v45 = vpop.f32.mrf.mxu0 }
 0x47c   :  { %v3184_v38 = vmax.f32 %v3179_v47, 0.0 }
 0x47e   :  { %v3185_v48 = vpack.c.bf16 %v3184_v38, %v3184_v38 }
 0x480   :  { %4019 = vmatmul.mubr.bf16.vlgmr.msra.gmra.mxu1 %v3185_v48 }
 0x481   :  { %4058 = vmatprep.mubr.msk.bf16.mxu1 %vm4861_vm0, %v4860_v3  ;;  %4043 = vmatpush3.bf16.msra.mxu1 %v4691_v52 }
 0x482   :  { %4044 = vmatprep.subr.bf16.mxu1 %v4860_v3 }
 0x485   :  { %4045 = vmatpush3.bf16.msra.mxu1 %v4692_v53 }
 0x486   :  { %4046 = vmatprep.subr.bf16.mxu1 %v4860_v3 }
 0x489   :  { %4047 = vmatpush3.bf16.msra.mxu1 %v4693_v54 }
 0x48a   :  { %4048 = vmatprep.subr.bf16.mxu1 %v4860_v3 }
 0x48d   :  { %4049 = vmatpush3.bf16.msra.mxu1 %v4694_v9 }
 0x48e   :  { %4050 = vmatprep.subr.bf16.mxu1 %v4860_v3 }
 0x491   :  { %4051 = vmatpush3.bf16.msra.mxu1 %v4695_v11 }
 0x492   :  { %4052 = vmatprep.subr.bf16.mxu1 %v4860_v3 }
 0x495   :  { %4053 = vmatpush3.bf16.msra.mxu1 %v4696_v55 }
 0x496   :  { %4054 = vmatprep.subr.bf16.mxu1 %v4860_v3 }
 0x499   :  { %4055 = vmatpush3.bf16.msra.mxu1 %v4697_v1 }
 0x49a   :  { %4056 = vmatprep.subr.bf16.mxu1 %v4860_v3 }
 0x49d   :  { %4057 = vmatpush3.bf16.msra.mxu1 %v4698_v2 }
 0x540   :  { %v3288_v58 = vpop.f32.mrf.mxu1 }
 0x541   :  { %v3289_v59 = vadd.f32 %v3288_v58, %v3205_v57 }
 0x542   :  { %v4020_v60 = vpop.f32.mrf.mxu1 }
 0x543   :  { %v3294_v61 = vmax.f32 %v3289_v59, 0.0 }
 0x544   :  { %v3291_v62 = vpop.f32.mrf.mxu1 }
 0x545   :  { %v3295_v63 = vpack.c.bf16 %v3294_v61, %v3294_v61 }
 0x546   :  { %v4021_v0 = vpop.f32.mrf.mxu1 }
 0x547   :  { %4039 = vmatmul.mubr.bf16.vlgmr.msra.gmra.mxu0 %v3295_v63 }
 0x607   :  { %v3398_v8 = vpop.f32.mrf.mxu0 }
 0x608   :  { %v3399_v10 = vadd.f32 %v3398_v8, %v3315_v5 }
 0x609   :  { %v4040_v12 = vpop.f32.mrf.mxu0 }
 0x60a   :  { %v3404_v14 = vmax.f32 %v3399_v10, 0.0 }
 0x60b   :  { %v3401_v15 = vpop.f32.mrf.mxu0 }
 0x60c   :  { %v3405_v16 = vpack.c.bf16 %v3404_v14, %v3404_v14 }
 0x60d   :  { %v4041_v17 = vpop.f32.mrf.mxu0 }
 0x60e   :  { %4059 = vmatmul.mubr.bf16.vlgmr.msra.gmra.mxu1 %v3405_v16 }
 0x6ce   :  { %v3508_v20 = vpop.f32.mrf.mxu1 }
 0x6cf   :  { %v3509_v3 = vadd.f32 %v3508_v20, %v3425_v19 }
 0x6d0   :  { %v4060_v21 = vpop.f32.mrf.mxu1 }
 0x6d1   :  { %3514 = vst [vmem:[%s5095_s9] sm:$0xff] %v3509_v3 }
 0x6d2   :  { %v3511_v22 = vpop.f32.mrf.mxu1 }
 0x6d4   :  { %v4061_v23 = vpop.f32.mrf.mxu1 }
 0x6d5   :  { %3519 = vsyncpa [#allocation3], 1 }
 0x6d6   :  { %3520 = vsyncpa [#allocation5], 1 }
 0x6d7   :  { %3521 = vsyncpa [#allocation8], 1 }
 0x6d8   :  { %3522 = vsyncpa [#allocation11], 1 }

</bundles_post_ra>
